<compile_context>
chip_gen: v7x
topology: tpu7x:2x2x1
jax: 0.10.0
libtpu: 0.0.40
codegen_flags: <defaults>
</compile_context>

<pallas_src>
import functools

import numpy as np
import jax
import jax.numpy as jnp
from jax.experimental import pallas as pl
from jax.experimental.pallas import tpu as pltpu

K = 5          # APPNP power-iteration steps
ALPHA = 0.1    # APPNP teleport probability
MLPA = 0.001   # DualGNN MLP-A mixing coefficient
LANE = 128
_MISC_VMEM = 2 * 1024 * 1024


def _round_up(v, m):
    return (v + m - 1) // m * m


def _pad2(a, rows, cols):
    out = jnp.zeros((rows, cols), a.dtype)
    return out.at[: a.shape[0], : a.shape[1]].set(a)


# ---------------------------------------------------------------------------
# Device-aware VMEM budgeting (v5e/v6e: 128 MiB, v7x: 64 MiB per TensorCore)
# ---------------------------------------------------------------------------
def _device_vmem_budget():
    cap = 64 * 1024 * 1024                 # conservative fallback (v7x size)
    try:
        cap = int(pltpu.get_tpu_info().vmem_capacity_bytes)
    except Exception:
        pass
    # ~85% of physical: leaves headroom for Mosaic internal scratch and the
    # pipeline's own buffers (matters most on v7x's 64 MiB).
    return max(int(cap * 0.85), 32 * 1024 * 1024)


def _appnp_footprint(tm, n_pad, op, adj_bytes, resident_a):
    a = 2 * (1 if resident_a else 2) * tm * n_pad * adj_bytes  # A1+A2 (stream: dbl-buf)
    h = 2 * n_pad * op * 4                                     # h1+h2 whole-array resident
    base = 2 * tm * op * 4                                     # streamed base (dbl-buf)
    z = 2 * 2 * n_pad * op * adj_bytes                         # z1+z2 ping-pong scratch
    out = 2 * tm * op * 4                                      # output (dbl-buf)
    return a + h + base + z + out


def _plan_appnp(n_pad, op, adj_bytes, budget):
    # Resident-A fast path: the full adjacency is DMA'd once, not K times.
    if _appnp_footprint(n_pad, n_pad, op, adj_bytes, True) + _MISC_VMEM <= budget:
        return n_pad, True
    for tm in (8192, 4096, 2048, 1024, 512, 256, 128):
        if tm <= n_pad and n_pad % tm == 0 and \
                _appnp_footprint(tm, n_pad, op, adj_bytes, False) + _MISC_VMEM <= budget:
            return tm, False
    # Even a 128-row stream busts the budget -> the dense N^2 adjacency is the
    # real limit already.
    # TODO(synk): sparse / segment-sum adjacency formulation for large graphs.
    return 128, False


def _plan_mlp(n_pad, c_pad, hp, op, budget):
    w_bytes = (c_pad * 4 * hp + 4 * hp + 2 * hp * op + 2 * hp * op + 3 * op) * 4
    for tm in (n_pad, 8192, 4096, 2048, 1024, 512, 256, 128):
        if tm > n_pad or n_pad % tm != 0:
            continue
        fp = w_bytes + 2 * tm * c_pad * 4 + 3 * 2 * tm * op * 4 + tm * 4 * hp * 4
        if fp + _MISC_VMEM <= budget:
            return tm, fp
    tm = 128
    fp = w_bytes + 2 * tm * c_pad * 4 + 3 * 2 * tm * op * 4 + tm * 4 * hp * 4
    return tm, fp


# ---------------------------------------------------------------------------
# Kernel 1: fused row-wise MLPs
#   hidden = relu(x_all @ W1_fused + b1_fused)       (one wide matmul)
#   h1, h2 = per-head second layers
#   base   = single matmul over the offset+mlp_A hidden slots (0.001 / MLPA
#            folded into the weights on the host)
# ---------------------------------------------------------------------------
def mlp_fused_kernel(x_ref, w1_ref, b1_ref, w2ab_ref, w2base_ref, b2_ref,
                     h1_ref, h2_ref, base_ref, *, hp):
    x = x_ref[...]                                                 # (TM, C_pad)
    hcat = jnp.dot(x, w1_ref[...], preferred_element_type=jnp.float32)
    hcat = jnp.maximum(hcat + b1_ref[...], 0.0)                    # (TM, 4*HP)
    b2 = b2_ref[...]                                               # (3, OP)

    h1_ref[...] = jnp.dot(hcat[:, 0:hp], w2ab_ref[0],
                          preferred_element_type=jnp.float32) + b2[0:1, :]
    h2_ref[...] = jnp.dot(hcat[:, hp:2 * hp], w2ab_ref[1],
                          preferred_element_type=jnp.float32) + b2[1:2, :]
    base_ref[...] = jnp.dot(hcat[:, 2 * hp:4 * hp], w2base_ref[...],
                            preferred_element_type=jnp.float32) + b2[2:3, :]


# ---------------------------------------------------------------------------
# Kernel 2: K-step APPNP propagation for both adjacencies + combine/log_softmax
#   grid = (K, row_tiles), K outermost: every row tile of step k is finished
#   before step k+1 starts (the update reads the FULL previous z state).
# ---------------------------------------------------------------------------
def appnp_kernel(a1_ref, a2_ref, h1_ref, h2_ref, base_ref, out_ref,
                 z1_ref, z2_ref, *, tm, n_pad, k_steps, d_out, alpha, z_dtype):
    k = pl.program_id(0)          # propagation step (sequential)
    i = pl.program_id(1)          # row tile

    @pl.when(jnp.logical_and(k == 0, i == 0))
    def _init():                  # z <- h (cast once into the state dtype)
        z1_ref[pl.ds(0, n_pad), :] = h1_ref[...].astype(z_dtype)
        z2_ref[pl.ds(0, n_pad), :] = h2_ref[...].astype(z_dtype)

    cur = k % 2                                    # ping-pong read slot
    rd = pl.multiple_of(cur * n_pad, n_pad)
    row0 = pl.multiple_of(i * tm, tm)

    a1 = a1_ref[...]                               # (TM, N_pad)
    a2 = a2_ref[...]
    z1_old = z1_ref[pl.ds(rd, n_pad), :]           # (N_pad, OP), adjacency dtype
    z2_old = z2_ref[pl.ds(rd, n_pad), :]

    # Interleaved A1/A2 updates for this row tile; MXU operand dtypes already
    # match (adjacency dtype), accumulation always f32.
    z1_new = (1.0 - alpha) * jnp.dot(a1, z1_old, preferred_element_type=jnp.float32) \
        + alpha * h1_ref[pl.ds(row0, tm), :]
    z2_new = (1.0 - alpha) * jnp.dot(a2, z2_old, preferred_element_type=jnp.float32) \
        + alpha * h2_ref[pl.ds(row0, tm), :]

    @pl.when(k < k_steps - 1)
    def _store_state():
        wr = pl.multiple_of((1 - cur) * n_pad + i * tm, tm)
        z1_ref[pl.ds(wr, tm), :] = z1_new.astype(z_dtype)
        z2_ref[pl.ds(wr, tm), :] = z2_new.astype(z_dtype)
        # Hygiene: in the streaming path the out block is written back every
        # step; keep it defined instead of shipping uninitialized VMEM.
        out_ref[...] = jnp.zeros_like(out_ref)

    @pl.when(k == k_steps - 1)
    def _finalize():
        logits = z1_new - z2_new + base_ref[...]
        col = jax.lax.broadcasted_iota(jnp.int32, logits.shape, 1)
        valid = col < d_out                         # mask lane padding
        m = jnp.max(jnp.where(valid, logits, -1e30), axis=1, keepdims=True)
        s = logits - m
        lse = jnp.log(jnp.sum(jnp.where(valid, jnp.exp(s), 0.0),
                              axis=1, keepdims=True))
        out_ref[...] = s - lse


# ---------------------------------------------------------------------------
# JAX glue: dense GCN-normalized adjacency (mirrors PyG gcn_norm +
# add_remaining_self_loops with fill value 1, flow = source_to_target)
# ---------------------------------------------------------------------------
def build_norm_adj(edge_index, edge_weight, num_nodes):
    src, dst = edge_index[0], edge_index[1]
    W = jnp.zeros((num_nodes, num_nodes), jnp.float32).at[dst, src].add(edge_weight)
    has_loop = (jnp.zeros((num_nodes,), jnp.float32)
                .at[src].add(jnp.where(src == dst, 1.0, 0.0))) > 0
    W = W + jnp.diag(jnp.where(has_loop, 0.0, 1.0))
    deg = W.sum(axis=1)
    dinv = jnp.where(deg > 0, 1.0 / jnp.sqrt(deg), 0.0)
    return dinv[:, None] * W * dinv[None, :]


def dual_gnn_forward(x, A_feat, edge_index, edge_weight, params,
                     adj_dtype=jnp.bfloat16):
    n, d_in = x.shape
    a_dim = A_feat.shape[1]
    hid = params["w1a"].shape[1]
    d_out = params["w2a"].shape[1]

    n_pad = _round_up(n, LANE)
    c_pad = _round_up(d_in + a_dim, LANE)
    hp = _round_up(2 * hid, LANE)          # one padded hidden slot per MLP head
    op = _round_up(d_out, LANE)

    adj_bytes = np.dtype(adj_dtype).itemsize
    budget = _device_vmem_budget()

    # --- DualGNN edge-weight remixing followed by APPNP_'s 0.0001 + 0.9999*ew ---
    ew1 = 0.0001 + 0.9999 * (1e-05 + edge_weight * 0.99998)
    ew2 = 0.0001 + 0.9999 * (0.99999 - edge_weight * 0.99998)
    a1 = _pad2(build_norm_adj(edge_index, ew1, n), n_pad, n_pad).astype(adj_dtype)
    a2 = _pad2(build_norm_adj(edge_index, ew2, n), n_pad, n_pad).astype(adj_dtype)
    # TODO(synk): the dense N^2 adjacency glue is the scaling limit; a
    # sparse/segment formulation is needed before this handles huge graphs.

    # --- fused / lane-padded parameters ---
    x_all = _pad2(jnp.concatenate([x, A_feat], axis=1), n_pad, c_pad)

    w1f = jnp.zeros((c_pad, 4 * hp), jnp.float32)
    w1f = w1f.at[:d_in, 0:hid].set(params["w1a"])                                # net1 L1
    w1f = w1f.at[:d_in, hp:hp + hid].set(params["w1b"])                          # net2 L1
    w1f = w1f.at[:d_in, 2 * hp:2 * hp + 2 * hid].set(params["wo1"])              # offset L1
    w1f = w1f.at[d_in:d_in + a_dim, 3 * hp:3 * hp + 2 * hid].set(params["wA1"])  # mlp_A L1

    b1f = jnp.zeros((1, 4 * hp), jnp.float32)
    b1f = b1f.at[:, 0:hid].set(params["b1a"])
    b1f = b1f.at[:, hp:hp + hid].set(params["b1b"])
    b1f = b1f.at[:, 2 * hp:2 * hp + 2 * hid].set(params["bo1"])
    b1f = b1f.at[:, 3 * hp:3 * hp + 2 * hid].set(params["bA1"])

    w2ab = jnp.stack([_pad2(params["w2a"], hp, op), _pad2(params["w2b"], hp, op)])

    # offset/mlp_A second layers folded into one matmul, constants pre-applied.
    w2base = jnp.zeros((2 * hp, op), jnp.float32)
    w2base = w2base.at[:2 * hid, :d_out].set(0.001 * params["wo2"])
    w2base = w2base.at[hp:hp + 2 * hid, :d_out].set(MLPA * params["wA2"])

    b2s = jnp.concatenate(
        [_pad2(params["b2a"], 1, op),
         _pad2(params["b2b"], 1, op),
         _pad2(0.001 * params["bo2"] + MLPA * params["bA2"], 1, op)], axis=0)    # (3, OP)

    # Whole-array, single-buffered VMEM residency (fetched from HBM once).
    vmem_full = pl.BlockSpec(memory_space=pltpu.MemorySpace.VMEM)

    # --- Kernel 1: fused MLPs over an independently sized row tile ---
    tm1, mlp_fp = _plan_mlp(n_pad, c_pad, hp, op, budget)
    t1 = n_pad // tm1
    h1, h2, base = pl.pallas_call(
        functools.partial(mlp_fused_kernel, hp=hp),
        out_shape=[jax.ShapeDtypeStruct((n_pad, op), jnp.float32)] * 3,
        grid_spec=pltpu.PrefetchScalarGridSpec(
            num_scalar_prefetch=0, grid=(t1,),
            in_specs=[pl.BlockSpec((tm1, c_pad), lambda i: (i, 0)),
                      vmem_full, vmem_full, vmem_full, vmem_full, vmem_full],
            out_specs=[pl.BlockSpec((tm1, op), lambda i: (i, 0))] * 3),
        compiler_params=pltpu.CompilerParams(
            dimension_semantics=("parallel",),
            vmem_limit_bytes=int(min(max(mlp_fp + _MISC_VMEM, 32 << 20), budget))),
    )(x_all, w1f, b1f, w2ab, w2base, b2s)

    # --- Kernel 2: K-step propagation ---
    tm, resident_a = _plan_appnp(n_pad, op, adj_bytes, budget)
    t = n_pad // tm
    appnp_fp = _appnp_footprint(tm, n_pad, op, adj_bytes, resident_a)

    if resident_a:
        # Fast path: A1/A2 fit on-chip -> DMA'd exactly once, single-buffered,
        # for the whole (K, 1) grid (tm == n_pad so the kernel sees full rows).
        a_spec = vmem_full
    else:
        # Streaming path: one (tm, n_pad) adjacency row tile per grid step.
        a_spec = pl.BlockSpec((tm, n_pad), lambda kk, ii: (ii, 0))

    out_pad = pl.pallas_call(
        functools.partial(appnp_kernel, tm=tm, n_pad=n_pad, k_steps=K,
                          d_out=d_out, alpha=ALPHA, z_dtype=adj_dtype),
        out_shape=jax.ShapeDtypeStruct((n_pad, op), jnp.float32),
        grid_spec=pltpu.PrefetchScalarGridSpec(
            num_scalar_prefetch=0, grid=(K, t),
            in_specs=[a_spec,                                         # A1
                      a_spec,                                         # A2
                      vmem_full,                                      # h1 (resident)
                      vmem_full,                                      # h2 (resident)
                      pl.BlockSpec((tm, op), lambda kk, ii: (ii, 0))],  # base (streamed)
            out_specs=pl.BlockSpec((tm, op), lambda kk, ii: (ii, 0)),
            scratch_shapes=[pltpu.VMEM((2 * n_pad, op), adj_dtype),   # z1 ping-pong
                            pltpu.VMEM((2 * n_pad, op), adj_dtype)]),  # z2 ping-pong
        # Row-tile axis must stay "arbitrary": each step reads the FULL z state
        # held in per-core scratch.
        # TODO(synk): v7x megacore split (half the row tiles per TensorCore with
        # z replicated/exchanged via VMEM_SHARED + core barrier) left undone.
        compiler_params=pltpu.CompilerParams(
            dimension_semantics=("arbitrary", "arbitrary"),
            vmem_limit_bytes=int(min(max(appnp_fp + _MISC_VMEM, 32 << 20), budget))),
    )(a1, a2, h1, h2, base)

    return out_pad[:n, :d_out]


# ---------------------------------------------------------------------------
# Pure-JAX reference (correctness check)
# ---------------------------------------------------------------------------
def reference_forward(x, A_feat, edge_index, edge_weight, params):
    def mlp2(v, w1, b1, w2, b2):
        return jnp.maximum(v @ w1 + b1, 0.0) @ w2 + b2

    def appnp(h, A):
        z = h
        for _ in range(K):
            z = (1.0 - ALPHA) * (A @ z) + ALPHA * h
        return z

    n = x.shape[0]
    ew1 = 0.0001 + 0.9999 * (1e-05 + edge_weight * 0.99998)
    ew2 = 0.0001 + 0.9999 * (0.99999 - edge_weight * 0.99998)
    A1 = build_norm_adj(edge_index, ew1, n)
    A2 = build_norm_adj(edge_index, ew2, n)

    x1 = appnp(mlp2(x, params["w1a"], params["b1a"], params["w2a"], params["b2a"]), A1)
    x2 = appnp(mlp2(x, params["w1b"], params["b1b"], params["w2b"], params["b2b"]), A2)
    xo = mlp2(x, params["wo1"], params["bo1"], params["wo2"], params["bo2"])
    xa = mlp2(A_feat, params["wA1"], params["bA1"], params["wA2"], params["bA2"])
    out = x1 - x2 + 0.001 * xo + MLPA * xa
    return jax.nn.log_softmax(out, axis=1)


# ---------------------------------------------------------------------------
# Deterministic parameter init (torch.nn.Linear-style uniform bounds)
# ---------------------------------------------------------------------------
def init_linear(key, fan_in, fan_out):
    kw, kb = jax.random.split(key)
    bound = 1.0 / jnp.sqrt(fan_in)
    w = jax.random.uniform(kw, (fan_in, fan_out), jnp.float32, -bound, bound)
    b = jax.random.uniform(kb, (1, fan_out), jnp.float32, -bound, bound)
    return w, b


if __name__ == "__main__":
    N, D_IN, HID, D_OUT, A_DIM, E = 16, 8, 16, 8, 1, 48

    key = jax.random.PRNGKey(0)
    keys = jax.random.split(key, 16)

    params = {}
    params["w1a"], params["b1a"] = init_linear(keys[0], D_IN, HID)
    params["w2a"], params["b2a"] = init_linear(keys[1], HID, D_OUT)
    params["w1b"], params["b1b"] = init_linear(keys[2], D_IN, HID)
    params["w2b"], params["b2b"] = init_linear(keys[3], HID, D_OUT)
    params["wo1"], params["bo1"] = init_linear(keys[4], D_IN, 2 * HID)
    params["wo2"], params["bo2"] = init_linear(keys[5], 2 * HID, D_OUT)
    params["wA1"], params["bA1"] = init_linear(keys[6], A_DIM, 2 * HID)
    params["wA2"], params["bA2"] = init_linear(keys[7], 2 * HID, D_OUT)

    x = jax.random.normal(keys[8], (N, D_IN), jnp.float32)
    A_feat = jax.random.normal(keys[9], (N, A_DIM), jnp.float32)
    edge_index = jax.random.randint(keys[10], (2, E), 0, N, jnp.int32)
    edge_weight = jax.random.uniform(keys[11], (E,), jnp.float32, 0.05, 0.95)

    ref = reference_forward(x, A_feat, edge_index, edge_weight, params)

    # f32 adjacency: tight check against the pure-JAX reference.
    fwd_f32 = jax.jit(functools.partial(dual_gnn_forward, adj_dtype=jnp.float32))
    out = jax.block_until_ready(fwd_f32(x, A_feat, edge_index, edge_weight, params))
    assert out.shape == (N, D_OUT)
    assert jnp.allclose(out, ref, rtol=2e-3, atol=2e-3), "f32 mismatch vs JAX reference"

    # bf16 adjacency (default: halves the roofline-critical A bytes).  The z
    # state also lives in bf16, so rounding compounds over the K steps ->
    # loose tolerance, acceptable for inference.
    fwd_bf16 = jax.jit(functools.partial(dual_gnn_forward, adj_dtype=jnp.bfloat16))
    out_bf16 = jax.block_until_ready(fwd_bf16(x, A_feat, edge_index, edge_weight, params))
    assert out_bf16.shape == (N, D_OUT)
    assert jnp.allclose(out_bf16, ref, rtol=0.15, atol=0.15), "bf16 mismatch vs JAX reference"

    print("KERNEL_OK")
</pallas_src>

<mosaic_0001>
module attributes {stable_mosaic.version = 11 : i64} {
  func.func private @main(%arg0: i32) attributes {dimension_semantics = [#tpu.dimension_semantics<core_parallel>], iteration_bounds = array<i64: 2>, tpu.core_type = #tpu.core_type<sc_scalar_subcore>, window_params = []} {
    return
  }
}

module attributes {stable_mosaic.version = 11 : i64} {
  func.func private @main(%arg0: i32) attributes {dimension_semantics = [#tpu.dimension_semantics<core_parallel>], iteration_bounds = array<i64: 2>, tpu.core_type = #tpu.core_type<sc_scalar_subcore>, window_params = []} {
    return
  }
}

module attributes {stable_mosaic.version = 11 : i64} {
  func.func @mlp_fused_kernel(%arg0: i32, %arg1: memref<128x128xf32, #tpu.memory_space<vmem>>, %arg2: memref<128x512xf32, #tpu.memory_space<vmem>>, %arg3: memref<1x512xf32, #tpu.memory_space<vmem>>, %arg4: memref<2x128x128xf32, #tpu.memory_space<vmem>>, %arg5: memref<256x128xf32, #tpu.memory_space<vmem>>, %arg6: memref<3x128xf32, #tpu.memory_space<vmem>>, %arg7: memref<128x128xf32, #tpu.memory_space<vmem>>, %arg8: memref<128x128xf32, #tpu.memory_space<vmem>>, %arg9: memref<128x128xf32, #tpu.memory_space<vmem>>) attributes {dimension_semantics = [#tpu.dimension_semantics<parallel>], iteration_bounds = array<i64: 1>, scalar_prefetch = 0 : i64, scratch_operands = 0 : i64, tpu.core_type = #tpu.core_type<tc>, window_params = [{transform_indices = @transform_0, window_bounds = array<i64: 128, 128>}, {pipeline_mode = #tpu.pipeline_mode<synchronous>, transform_indices = @transform_1, window_bounds = array<i64: 128, 512>}, {pipeline_mode = #tpu.pipeline_mode<synchronous>, transform_indices = @transform_2, window_bounds = array<i64: 1, 512>}, {pipeline_mode = #tpu.pipeline_mode<synchronous>, transform_indices = @transform_3, window_bounds = array<i64: 2, 128, 128>}, {pipeline_mode = #tpu.pipeline_mode<synchronous>, transform_indices = @transform_4, window_bounds = array<i64: 256, 128>}, {pipeline_mode = #tpu.pipeline_mode<synchronous>, transform_indices = @transform_5, window_bounds = array<i64: 3, 128>}, {transform_indices = @transform_6, window_bounds = array<i64: 128, 128>}, {transform_indices = @transform_7, window_bounds = array<i64: 128, 128>}, {transform_indices = @transform_8, window_bounds = array<i64: 128, 128>}]} {
    %c0 = arith.constant 0 : index
    %c0_0 = arith.constant 0 : index
    %0 = vector.load %arg1[%c0, %c0_0] : memref<128x128xf32, #tpu.memory_space<vmem>>, vector<128x128xf32>
    %c0_1 = arith.constant 0 : index
    %c0_2 = arith.constant 0 : index
    %1 = vector.load %arg2[%c0_1, %c0_2] : memref<128x512xf32, #tpu.memory_space<vmem>>, vector<128x512xf32>
    %cst = arith.constant dense<0.000000e+00> : vector<128x512xf32>
    %2 = tpu.matmul %0, %1, %cst {dimension_numbers = #tpu.dot_dimension_numbers<[1], [0], [0], [1], [0, 0, 1, 1], [], []>} : vector<128x128xf32>, vector<128x512xf32>, vector<128x512xf32> -> vector<128x512xf32>
    %c0_3 = arith.constant 0 : index
    %c0_4 = arith.constant 0 : index
    %3 = vector.load %arg3[%c0_3, %c0_4] : memref<1x512xf32, #tpu.memory_space<vmem>>, vector<1x512xf32>
    %4 = vector.broadcast %3 : vector<1x512xf32> to vector<128x512xf32>
    %5 = arith.addf %2, %4 : vector<128x512xf32>
    %cst_5 = arith.constant 0.000000e+00 : f32
    %6 = vector.broadcast %cst_5 : f32 to vector<128x512xf32>
    %7 = arith.maximumf %5, %6 : vector<128x512xf32>
    %c0_6 = arith.constant 0 : index
    %c0_7 = arith.constant 0 : index
    %8 = vector.load %arg6[%c0_6, %c0_7] : memref<3x128xf32, #tpu.memory_space<vmem>>, vector<3x128xf32>
    %9 = vector.extract_strided_slice %7 {offsets = [0, 0], sizes = [128, 128], strides = [1, 1]} : vector<128x512xf32> to vector<128x128xf32>
    %c0_8 = arith.constant 0 : index
    %c0_9 = arith.constant 0 : index
    %c0_10 = arith.constant 0 : index
    %10 = vector.load %arg4[%c0_8, %c0_9, %c0_10] : memref<2x128x128xf32, #tpu.memory_space<vmem>>, vector<1x128x128xf32>
    %11 = vector.shape_cast %10 : vector<1x128x128xf32> to vector<128x128xf32>
    %cst_11 = arith.constant dense<0.000000e+00> : vector<128x128xf32>
    %12 = tpu.matmul %9, %11, %cst_11 {dimension_numbers = #tpu.dot_dimension_numbers<[1], [0], [0], [1], [0, 0, 1, 1], [], []>} : vector<128x128xf32>, vector<128x128xf32>, vector<128x128xf32> -> vector<128x128xf32>
    %13 = vector.extract_strided_slice %8 {offsets = [0, 0], sizes = [1, 128], strides = [1, 1]} : vector<3x128xf32> to vector<1x128xf32>
    %14 = vector.broadcast %13 : vector<1x128xf32> to vector<128x128xf32>
    %15 = arith.addf %12, %14 : vector<128x128xf32>
    %c0_12 = arith.constant 0 : index
    %c0_13 = arith.constant 0 : index
    %16 = vector.load %arg7[%c0_12, %c0_13] : memref<128x128xf32, #tpu.memory_space<vmem>>, vector<128x128xf32>
    tpu.vector_store %arg7[%c0_12, %c0_13], %15 {strides = array<i32>} : memref<128x128xf32, #tpu.memory_space<vmem>>, vector<128x128xf32>,
    %17 = vector.extract_strided_slice %7 {offsets = [0, 128], sizes = [128, 128], strides = [1, 1]} : vector<128x512xf32> to vector<128x128xf32>
    %c1 = arith.constant 1 : index
    %c0_14 = arith.constant 0 : index
    %c0_15 = arith.constant 0 : index
    %18 = vector.load %arg4[%c1, %c0_14, %c0_15] : memref<2x128x128xf32, #tpu.memory_space<vmem>>, vector<1x128x128xf32>
    %19 = vector.shape_cast %18 : vector<1x128x128xf32> to vector<128x128xf32>
    %cst_16 = arith.constant dense<0.000000e+00> : vector<128x128xf32>
    %20 = tpu.matmul %17, %19, %cst_16 {dimension_numbers = #tpu.dot_dimension_numbers<[1], [0], [0], [1], [0, 0, 1, 1], [], []>} : vector<128x128xf32>, vector<128x128xf32>, vector<128x128xf32> -> vector<128x128xf32>
    %21 = vector.extract_strided_slice %8 {offsets = [1, 0], sizes = [1, 128], strides = [1, 1]} : vector<3x128xf32> to vector<1x128xf32>
    %22 = vector.broadcast %21 : vector<1x128xf32> to vector<128x128xf32>
    %23 = arith.addf %20, %22 : vector<128x128xf32>
    %c0_17 = arith.constant 0 : index
    %c0_18 = arith.constant 0 : index
    %24 = vector.load %arg8[%c0_17, %c0_18] : memref<128x128xf32, #tpu.memory_space<vmem>>, vector<128x128xf32>
    tpu.vector_store %arg8[%c0_17, %c0_18], %23 {strides = array<i32>} : memref<128x128xf32, #tpu.memory_space<vmem>>, vector<128x128xf32>,
    %25 = vector.extract_strided_slice %7 {offsets = [0, 256], sizes = [128, 256], strides = [1, 1]} : vector<128x512xf32> to vector<128x256xf32>
    %c0_19 = arith.constant 0 : index
    %c0_20 = arith.constant 0 : index
    %26 = vector.load %arg5[%c0_19, %c0_20] : memref<256x128xf32, #tpu.memory_space<vmem>>, vector<256x128xf32>
    %cst_21 = arith.constant dense<0.000000e+00> : vector<128x128xf32>
    %27 = tpu.matmul %25, %26, %cst_21 {dimension_numbers = #tpu.dot_dimension_numbers<[1], [0], [0], [1], [0, 0, 1, 1], [], []>} : vector<128x256xf32>, vector<256x128xf32>, vector<128x128xf32> -> vector<128x128xf32>
    %28 = vector.extract_strided_slice %8 {offsets = [2, 0], sizes = [1, 128], strides = [1, 1]} : vector<3x128xf32> to vector<1x128xf32>
    %29 = vector.broadcast %28 : vector<1x128xf32> to vector<128x128xf32>
    %30 = arith.addf %27, %29 : vector<128x128xf32>
    %c0_22 = arith.constant 0 : index
    %c0_23 = arith.constant 0 : index
    %31 = vector.load %arg9[%c0_22, %c0_23] : memref<128x128xf32, #tpu.memory_space<vmem>>, vector<128x128xf32>
    tpu.vector_store %arg9[%c0_22, %c0_23], %30 {strides = array<i32>} : memref<128x128xf32, #tpu.memory_space<vmem>>, vector<128x128xf32>,
    return
  }
  func.func @transform_0(%arg0: i32) -> (i32, i32) {
    %c0_i32 = arith.constant 0 : i32
    %c0_i32_0 = arith.constant 0 : i32
    return %arg0, %c0_i32 : i32, i32
  }
  func.func @transform_1(%arg0: i32) -> (i32, i32) {
    %c0_i32 = arith.constant 0 : i32
    %c0_i32_0 = arith.constant 0 : i32
    %c0_i32_1 = arith.constant 0 : i32
    return %c0_i32, %c0_i32_0 : i32, i32
  }
  func.func @transform_2(%arg0: i32) -> (i32, i32) {
    %c0_i32 = arith.constant 0 : i32
    %c0_i32_0 = arith.constant 0 : i32
    %c0_i32_1 = arith.constant 0 : i32
    return %c0_i32, %c0_i32_0 : i32, i32
  }
  func.func @transform_3(%arg0: i32) -> (i32, i32, i32) {
    %c0_i32 = arith.constant 0 : i32
    %c0_i32_0 = arith.constant 0 : i32
    %c0_i32_1 = arith.constant 0 : i32
    %c0_i32_2 = arith.constant 0 : i32
    return %c0_i32, %c0_i32_0, %c0_i32_1 : i32, i32, i32
  }
  func.func @transform_4(%arg0: i32) -> (i32, i32) {
    %c0_i32 = arith.constant 0 : i32
    %c0_i32_0 = arith.constant 0 : i32
    %c0_i32_1 = arith.constant 0 : i32
    return %c0_i32, %c0_i32_0 : i32, i32
  }
  func.func @transform_5(%arg0: i32) -> (i32, i32) {
    %c0_i32 = arith.constant 0 : i32
    %c0_i32_0 = arith.constant 0 : i32
    %c0_i32_1 = arith.constant 0 : i32
    return %c0_i32, %c0_i32_0 : i32, i32
  }
  func.func @transform_6(%arg0: i32) -> (i32, i32) {
    %c0_i32 = arith.constant 0 : i32
    %c0_i32_0 = arith.constant 0 : i32
    return %arg0, %c0_i32 : i32, i32
  }
  func.func @transform_7(%arg0: i32) -> (i32, i32) {
    %c0_i32 = arith.constant 0 : i32
    %c0_i32_0 = arith.constant 0 : i32
    return %arg0, %c0_i32 : i32, i32
  }
  func.func @transform_8(%arg0: i32) -> (i32, i32) {
    %c0_i32 = arith.constant 0 : i32
    %c0_i32_0 = arith.constant 0 : i32
    return %arg0, %c0_i32 : i32, i32
  }
}

module attributes {stable_mosaic.version = 11 : i64} {
  func.func @appnp_kernel(%arg0: i32, %arg1: i32, %arg2: memref<128x128xf32, #tpu.memory_space<vmem>>, %arg3: memref<128x128xf32, #tpu.memory_space<vmem>>, %arg4: memref<128x128xf32, #tpu.memory_space<vmem>>, %arg5: memref<128x128xf32, #tpu.memory_space<vmem>>, %arg6: memref<128x128xf32, #tpu.memory_space<vmem>>, %arg7: memref<128x128xf32, #tpu.memory_space<vmem>>, %arg8: memref<256x128xf32, #tpu.memory_space<vmem>>, %arg9: memref<256x128xf32, #tpu.memory_space<vmem>>) attributes {dimension_semantics = [#tpu.dimension_semantics<arbitrary>, #tpu.dimension_semantics<arbitrary>], iteration_bounds = array<i64: 5, 1>, scalar_prefetch = 0 : i64, scratch_operands = 2 : i64, tpu.core_type = #tpu.core_type<tc>, window_params = [{pipeline_mode = #tpu.pipeline_mode<synchronous>, transform_indices = @transform_0, window_bounds = array<i64: 128, 128>}, {pipeline_mode = #tpu.pipeline_mode<synchronous>, transform_indices = @transform_1, window_bounds = array<i64: 128, 128>}, {pipeline_mode = #tpu.pipeline_mode<synchronous>, transform_indices = @transform_2, window_bounds = array<i64: 128, 128>}, {pipeline_mode = #tpu.pipeline_mode<synchronous>, transform_indices = @transform_3, window_bounds = array<i64: 128, 128>}, {transform_indices = @transform_4, window_bounds = array<i64: 128, 128>}, {transform_indices = @transform_5, window_bounds = array<i64: 128, 128>}]} {
    %c0_i32 = arith.constant 0 : i32
    %0 = arith.cmpi eq, %arg0, %c0_i32 : i32
    %c0_i32_0 = arith.constant 0 : i32
    %1 = arith.cmpi eq, %arg1, %c0_i32_0 : i32
    %2 = arith.andi %0, %1 : i1
    %3 = arith.extui %2 : i1 to i32
    %c0_i32_1 = arith.constant 0 : i32
    %4 = arith.cmpi ne, %3, %c0_i32_1 : i32
    scf.if %4 {
      %c0_22 = arith.constant 0 : index
      %c0_23 = arith.constant 0 : index
      %47 = vector.load %arg4[%c0_22, %c0_23] : memref<128x128xf32, #tpu.memory_space<vmem>>, vector<128x128xf32>
      %c0_24 = arith.constant 0 : index
      %c0_25 = arith.constant 0 : index
      %48 = vector.load %arg8[%c0_24, %c0_25] : memref<256x128xf32, #tpu.memory_space<vmem>>, vector<128x128xf32>
      tpu.vector_store %arg8[%c0_24, %c0_25], %47 {strides = array<i32>} : memref<256x128xf32, #tpu.memory_space<vmem>>, vector<128x128xf32>,
      %c0_26 = arith.constant 0 : index
      %c0_27 = arith.constant 0 : index
      %49 = vector.load %arg5[%c0_26, %c0_27] : memref<128x128xf32, #tpu.memory_space<vmem>>, vector<128x128xf32>
      %c0_28 = arith.constant 0 : index
      %c0_29 = arith.constant 0 : index
      %50 = vector.load %arg9[%c0_28, %c0_29] : memref<256x128xf32, #tpu.memory_space<vmem>>, vector<128x128xf32>
      tpu.vector_store %arg9[%c0_28, %c0_29], %49 {strides = array<i32>} : memref<256x128xf32, #tpu.memory_space<vmem>>, vector<128x128xf32>,
    } else {
    }
    %c2_i32 = arith.constant 2 : i32
    %c0_i32_2 = arith.constant 0 : i32
    %5 = arith.cmpi eq, %c2_i32, %c0_i32_2 : i32
    %c1_i32 = arith.constant 1 : i32
    %6 = arith.select %5, %c1_i32, %c2_i32 : i32
    %7 = arith.remsi %arg0, %6 : i32
    %c0_i32_3 = arith.constant 0 : i32
    %8 = arith.cmpi ne, %7, %c0_i32_3 : i32
    %c0_i32_4 = arith.constant 0 : i32
    %9 = arith.cmpi slt, %7, %c0_i32_4 : i32
    %c0_i32_5 = arith.constant 0 : i32
    %10 = arith.cmpi slt, %6, %c0_i32_5 : i32
    %11 = arith.xori %9, %10 : i1
    %12 = arith.andi %11, %8 : i1
    %13 = arith.addi %7, %6 : i32
    %14 = arith.select %12, %13, %7 : i32
    %c128_i32 = arith.constant 128 : i32
    %15 = arith.muli %14, %c128_i32 : i32
    %16 = tpu.assume_multiple %15, 128 : i32
    %c128_i32_6 = arith.constant 128 : i32
    %17 = arith.muli %arg1, %c128_i32_6 : i32
    %18 = tpu.assume_multiple %17, 128 : i32
    %c0 = arith.constant 0 : index
    %c0_7 = arith.constant 0 : index
    %19 = vector.load %arg2[%c0, %c0_7] : memref<128x128xf32, #tpu.memory_space<vmem>>, vector<128x128xf32>
    %c0_8 = arith.constant 0 : index
    %c0_9 = arith.constant 0 : index
    %20 = vector.load %arg3[%c0_8, %c0_9] : memref<128x128xf32, #tpu.memory_space<vmem>>, vector<128x128xf32>
    %21 = arith.index_cast %16 : i32 to index
    %c0_10 = arith.constant 0 : index
    %22 = vector.load %arg8[%21, %c0_10] : memref<256x128xf32, #tpu.memory_space<vmem>>, vector<128x128xf32>
    %23 = arith.index_cast %16 : i32 to index
    %c0_11 = arith.constant 0 : index
    %24 = vector.load %arg9[%23, %c0_11] : memref<256x128xf32, #tpu.memory_space<vmem>>, vector<128x128xf32>
    %cst = arith.constant dense<0.000000e+00> : vector<128x128xf32>
    %25 = tpu.matmul %19, %22, %cst {dimension_numbers = #tpu.dot_dimension_numbers<[1], [0], [0], [1], [0, 0, 1, 1], [], []>} : vector<128x128xf32>, vector<128x128xf32>, vector<128x128xf32> -> vector<128x128xf32>
    %cst_12 = arith.constant 0.899999976 : f32
    %26 = vector.broadcast %cst_12 : f32 to vector<128x128xf32>
    %27 = arith.mulf %26, %25 : vector<128x128xf32>
    %28 = arith.index_cast %18 : i32 to index
    %c0_13 = arith.constant 0 : index
    %29 = vector.load %arg4[%28, %c0_13] : memref<128x128xf32, #tpu.memory_space<vmem>>, vector<128x128xf32>
    %cst_14 = arith.constant 1.000000e-01 : f32
    %30 = vector.broadcast %cst_14 : f32 to vector<128x128xf32>
    %31 = arith.mulf %30, %29 : vector<128x128xf32>
    %32 = arith.addf %27, %31 : vector<128x128xf32>
    %cst_15 = arith.constant dense<0.000000e+00> : vector<128x128xf32>
    %33 = tpu.matmul %20, %24, %cst_15 {dimension_numbers = #tpu.dot_dimension_numbers<[1], [0], [0], [1], [0, 0, 1, 1], [], []>} : vector<128x128xf32>, vector<128x128xf32>, vector<128x128xf32> -> vector<128x128xf32>
    %cst_16 = arith.constant 0.899999976 : f32
    %34 = vector.broadcast %cst_16 : f32 to vector<128x128xf32>
    %35 = arith.mulf %34, %33 : vector<128x128xf32>
    %36 = arith.index_cast %18 : i32 to index
    %c0_17 = arith.constant 0 : index
    %37 = vector.load %arg5[%36, %c0_17] : memref<128x128xf32, #tpu.memory_space<vmem>>, vector<128x128xf32>
    %cst_18 = arith.constant 1.000000e-01 : f32
    %38 = vector.broadcast %cst_18 : f32 to vector<128x128xf32>
    %39 = arith.mulf %38, %37 : vector<128x128xf32>
    %40 = arith.addf %35, %39 : vector<128x128xf32>
    %c4_i32 = arith.constant 4 : i32
    %41 = arith.cmpi slt, %arg0, %c4_i32 : i32
    %42 = arith.extui %41 : i1 to i32
    %c0_i32_19 = arith.constant 0 : i32
    %43 = arith.cmpi ne, %42, %c0_i32_19 : i32
    scf.if %43 {
      %c1_i32_22 = arith.constant 1 : i32
      %47 = arith.subi %c1_i32_22, %14 : i32
      %c128_i32_23 = arith.constant 128 : i32
      %48 = arith.muli %47, %c128_i32_23 : i32
      %c128_i32_24 = arith.constant 128 : i32
      %49 = arith.muli %arg1, %c128_i32_24 : i32
      %50 = arith.addi %48, %49 : i32
      %51 = tpu.assume_multiple %50, 128 : i32
      %52 = arith.index_cast %51 : i32 to index
      %c0_25 = arith.constant 0 : index
      %53 = vector.load %arg8[%52, %c0_25] : memref<256x128xf32, #tpu.memory_space<vmem>>, vector<128x128xf32>
      tpu.vector_store %arg8[%52, %c0_25], %32 {strides = array<i32>} : memref<256x128xf32, #tpu.memory_space<vmem>>, vector<128x128xf32>,
      %54 = arith.index_cast %51 : i32 to index
      %c0_26 = arith.constant 0 : index
      %55 = vector.load %arg9[%54, %c0_26] : memref<256x128xf32, #tpu.memory_space<vmem>>, vector<128x128xf32>
      tpu.vector_store %arg9[%54, %c0_26], %40 {strides = array<i32>} : memref<256x128xf32, #tpu.memory_space<vmem>>, vector<128x128xf32>,
      %cst_27 = arith.constant 0.000000e+00 : f32
      %56 = vector.broadcast %cst_27 : f32 to vector<128x128xf32>
      %c0_28 = arith.constant 0 : index
      %c0_29 = arith.constant 0 : index
      %57 = vector.load %arg7[%c0_28, %c0_29] : memref<128x128xf32, #tpu.memory_space<vmem>>, vector<128x128xf32>
      tpu.vector_store %arg7[%c0_28, %c0_29], %56 {strides = array<i32>} : memref<128x128xf32, #tpu.memory_space<vmem>>, vector<128x128xf32>,
    } else {
    }
    %c4_i32_20 = arith.constant 4 : i32
    %44 = arith.cmpi eq, %arg0, %c4_i32_20 : i32
    %45 = arith.extui %44 : i1 to i32
    %c0_i32_21 = arith.constant 0 : i32
    %46 = arith.cmpi ne, %45, %c0_i32_21 : i32
    scf.if %46 {
      %47 = arith.subf %32, %40 : vector<128x128xf32>
      %c0_22 = arith.constant 0 : index
      %c0_23 = arith.constant 0 : index
      %48 = vector.load %arg6[%c0_22, %c0_23] : memref<128x128xf32, #tpu.memory_space<vmem>>, vector<128x128xf32>
      %49 = arith.addf %47, %48 : vector<128x128xf32>
      %50 = tpu.iota {dimensions = array<i32: 1>} : vector<128x128xi32>
      %c8_i32 = arith.constant 8 : i32
      %51 = vector.broadcast %c8_i32 : i32 to vector<128x128xi32>
      %52 = arith.cmpi slt, %50, %51 : vector<128x128xi32>
      %cst_24 = arith.constant -1.000000e+30 : f32
      %53 = vector.broadcast %cst_24 : f32 to vector<128x128xf32>
      %54 = arith.select %52, %49, %53 : vector<128x128xi1>, vector<128x128xf32>
      %cst_25 = arith.constant dense<0xFF800000> : vector<128xf32>
      %55 = vector.multi_reduction <maximumf>, %54, %cst_25 [1] : vector<128x128xf32> to vector<128xf32>
      %56 = vector.shape_cast %55 : vector<128xf32> to vector<128x1xf32>
      %57 = vector.broadcast %56 : vector<128x1xf32> to vector<128x128xf32>
      %58 = arith.subf %49, %57 : vector<128x128xf32>
      %59 = math.exp %58 : vector<128x128xf32>
      %cst_26 = arith.constant 0.000000e+00 : f32
      %60 = vector.broadcast %cst_26 : f32 to vector<128x128xf32>
      %61 = arith.select %52, %59, %60 : vector<128x128xi1>, vector<128x128xf32>
      %cst_27 = arith.constant dense<0.000000e+00> : vector<128xf32>
      %62 = vector.multi_reduction <add>, %61, %cst_27 [1] : vector<128x128xf32> to vector<128xf32>
      %63 = vector.shape_cast %62 : vector<128xf32> to vector<128x1xf32>
      %64 = math.log %63 : vector<128x1xf32>
      %65 = vector.broadcast %64 : vector<128x1xf32> to vector<128x128xf32>
      %66 = arith.subf %58, %65 : vector<128x128xf32>
      %c0_28 = arith.constant 0 : index
      %c0_29 = arith.constant 0 : index
      %67 = vector.load %arg7[%c0_28, %c0_29] : memref<128x128xf32, #tpu.memory_space<vmem>>, vector<128x128xf32>
      tpu.vector_store %arg7[%c0_28, %c0_29], %66 {strides = array<i32>} : memref<128x128xf32, #tpu.memory_space<vmem>>, vector<128x128xf32>,
    } else {
    }
    return
  }
  func.func @transform_0(%arg0: i32, %arg1: i32) -> (i32, i32) {
    %c0_i32 = arith.constant 0 : i32
    %c0_i32_0 = arith.constant 0 : i32
    %c0_i32_1 = arith.constant 0 : i32
    return %c0_i32, %c0_i32_0 : i32, i32
  }
  func.func @transform_1(%arg0: i32, %arg1: i32) -> (i32, i32) {
    %c0_i32 = arith.constant 0 : i32
    %c0_i32_0 = arith.constant 0 : i32
    %c0_i32_1 = arith.constant 0 : i32
    return %c0_i32, %c0_i32_0 : i32, i32
  }
  func.func @transform_2(%arg0: i32, %arg1: i32) -> (i32, i32) {
    %c0_i32 = arith.constant 0 : i32
    %c0_i32_0 = arith.constant 0 : i32
    %c0_i32_1 = arith.constant 0 : i32
    return %c0_i32, %c0_i32_0 : i32, i32
  }
  func.func @transform_3(%arg0: i32, %arg1: i32) -> (i32, i32) {
    %c0_i32 = arith.constant 0 : i32
    %c0_i32_0 = arith.constant 0 : i32
    %c0_i32_1 = arith.constant 0 : i32
    return %c0_i32, %c0_i32_0 : i32, i32
  }
  func.func @transform_4(%arg0: i32, %arg1: i32) -> (i32, i32) {
    %c0_i32 = arith.constant 0 : i32
    %c0_i32_0 = arith.constant 0 : i32
    return %arg1, %c0_i32 : i32, i32
  }
  func.func @transform_5(%arg0: i32, %arg1: i32) -> (i32, i32) {
    %c0_i32 = arith.constant 0 : i32
    %c0_i32_0 = arith.constant 0 : i32
    return %arg1, %c0_i32 : i32, i32
  }
}

</mosaic_0001>

<bundles_post_ra>
// kernel: dual_gnn_forward.2
= control target key start
LH: loop header
LB: loop body
LE: loop exit
PB: predicated region body
PF: predicated region fallthrough
CT: control target
= control target key end

     0   :  { %v1536_v3 = vmov 0.0   ;;  %s2459_s1 = inlined_call_operand.vmem [shape: f32[128,512], index: 1, kind: input, shape index: {}]   ;;  %s2460_s3 = inlined_call_operand.vmem [shape: f32[2,128,128], index: 3, kind: input, shape index: {}]   ;;  %s2461_s0 = inlined_call_operand.vmem [shape: f32[128,128], index: 0, kind: input, shape index: {}]   ;;  %s2462_s4 = inlined_call_operand.vmem [shape: f32[256,128], index: 4, kind: input, shape index: {}]   ;;  %s2463_s2 = inlined_call_operand.vmem [shape: f32[1,512], index: 2, kind: input, shape index: {}]   ;;  %s2464_s5 = inlined_call_operand.vmem [shape: f32[3,128], index: 5, kind: input, shape index: {}]   ;;  %s2465_s6 = inlined_call_operand.vmem [shape: f32[128,128], index: 6, kind: output, shape index: {0}]   ;;  %s2466_s7 = inlined_call_operand.vmem [shape: f32[128,128], index: 7, kind: output, shape index: {1}]   ;;  %s2467_s8 = inlined_call_operand.vmem [shape: f32[128,128], index: 8, kind: output, shape index: {2}]  }
   0x1   :  { %v43_v0 = vld [vmem:[%s2459_s1 + $0x8] sm:$0xff]  ;;  %v42_v2 = vld [vmem:[%s2459_s1] sm:$0xff]  ;;  %192 = vmatprep.mubr.f32.mxu0 %v1536_v3  ;;  %240 = vmatprep.mubr.f32.mxu1 %v1536_v3  ;;  %v45_v48 = vld [vmem:[%s2459_s1 + $0x18] sm:$0xff] }
   0x2   :  { %v47_v1 = vld [vmem:[%s2459_s1 + $0x28] sm:$0xff]  ;;  %v46_v5 = vld [vmem:[%s2459_s1 + $0x20] sm:$0xff]  ;;  %v49_v49 = vld [vmem:[%s2459_s1 + $0x38] sm:$0xff] }
   0x3   :  { %v1359_v4 = vpack.c.bf16 %v47_v1, %v43_v0  ;;  %v51_v6 = vld [vmem:[%s2459_s1 + $0x48] sm:$0xff]  ;;  %v1361_v8 = vpack.c.bf16 %v46_v5, %v42_v2  ;;  %v50_v10 = vld [vmem:[%s2459_s1 + $0x40] sm:$0xff]  ;;  %v1391_v53 = vpack.c.bf16 %v49_v49, %v45_v48  ;;  %v44_v54 = vld [vmem:[%s2459_s1 + $0x10] sm:$0xff] }
   0x4   :  { %v55_v7 = vld [vmem:[%s2459_s1 + $0x68] sm:$0xff]  ;;  %v54_v11 = vld [vmem:[%s2459_s1 + $0x60] sm:$0xff]  ;;  %v48_v55 = vld [vmem:[%s2459_s1 + $0x30] sm:$0xff] }
   0x5   :  { %v1363_v9 = vpack.c.bf16 %v55_v7, %v51_v6  ;;  %v59_v12 = vld [vmem:[%s2459_s1 + $0x88] sm:$0xff]  ;;  %1360 = vmatprep.subr.bf16.mxu0 %v1359_v4  ;;  %1519 = vmatprep.subr.bf16.mxu1 %v1359_v4  ;;  %v1365_v14 = vpack.c.bf16 %v54_v11, %v50_v10  ;;  %v58_v16 = vld [vmem:[%s2459_s1 + $0x80] sm:$0xff]  ;;  %v53_v57 = vld [vmem:[%s2459_s1 + $0x58] sm:$0xff]  ;;  %v1393_v61 = vpack.c.bf16 %v48_v55, %v44_v54 }
   0x6   :  { %v63_v13 = vld [vmem:[%s2459_s1 + $0xa8] sm:$0xff]  ;;  %1362 = vmatpush1.bf16.msra.mxu0 %v1361_v8  ;;  %1527 = vmatpush1.bf16.msra.mxu1 %v1361_v8  ;;  %v62_v17 = vld [vmem:[%s2459_s1 + $0xa0] sm:$0xff]  ;;  %v57_v58 = vld [vmem:[%s2459_s1 + $0x78] sm:$0xff] }
   0x7   :  { %1364 = vmatprep.subr.bf16.mxu0 %v1363_v9  ;;  %v1367_v15 = vpack.c.bf16 %v63_v13, %v59_v12  ;;  %1520 = vmatprep.subr.bf16.mxu1 %v1363_v9  ;;  %v67_v18 = vld [vmem:[%s2459_s1 + $0xc8] sm:$0xff]  ;;  %v1369_v20 = vpack.c.bf16 %v62_v17, %v58_v16  ;;  %v66_v22 = vld [vmem:[%s2459_s1 + $0xc0] sm:$0xff]  ;;  %v1395_v62 = vpack.c.bf16 %v57_v58, %v53_v57  ;;  %v52_v63 = vld [vmem:[%s2459_s1 + $0x50] sm:$0xff] }
   0x8   :  { %v71_v19 = vld [vmem:[%s2459_s1 + $0xe8] sm:$0xff]  ;;  %v70_v23 = vld [vmem:[%s2459_s1 + $0xe0] sm:$0xff]  ;;  %v56_v0 = vld [vmem:[%s2459_s1 + $0x70] sm:$0xff] }
   0x9   :  { %v1371_v21 = vpack.c.bf16 %v71_v19, %v67_v18  ;;  %v75_v24 = vld [vmem:[%s2459_s1 + $0x108] sm:$0xff]  ;;  %v1373_v26 = vpack.c.bf16 %v70_v23, %v66_v22  ;;  %v74_v28 = vld [vmem:[%s2459_s1 + $0x100] sm:$0xff]  ;;  %v61_v1 = vld [vmem:[%s2459_s1 + $0x98] sm:$0xff]  ;;  %v1397_v8 = vpack.c.bf16 %v56_v0, %v52_v63 }
   0xa   :  { %1366 = vmatpush1.bf16.msra.mxu0 %v1365_v14  ;;  %1528 = vmatpush1.bf16.msra.mxu1 %v1365_v14  ;;  %v79_v25 = vld [vmem:[%s2459_s1 + $0x128] sm:$0xff]  ;;  %v78_v29 = vld [vmem:[%s2459_s1 + $0x120] sm:$0xff]  ;;  %v65_v2 = vld [vmem:[%s2459_s1 + $0xb8] sm:$0xff] }
   0xb   :  { %1368 = vmatprep.subr.bf16.mxu0 %v1367_v15  ;;  %1521 = vmatprep.subr.bf16.mxu1 %v1367_v15  ;;  %v1375_v27 = vpack.c.bf16 %v79_v25, %v75_v24  ;;  %v83_v30 = vld [vmem:[%s2459_s1 + $0x148] sm:$0xff]  ;;  %v1377_v32 = vpack.c.bf16 %v78_v29, %v74_v28  ;;  %v82_v34 = vld [vmem:[%s2459_s1 + $0x140] sm:$0xff]  ;;  %v517_v4 = vld [vmem:[%s2460_s3 + $0x10] sm:$0xff]  ;;  %v1399_v9 = vpack.c.bf16 %v65_v2, %v61_v1 }
   0xc   :  { %v87_v31 = vld [vmem:[%s2459_s1 + $0x168] sm:$0xff]  ;;  %v86_v35 = vld [vmem:[%s2459_s1 + $0x160] sm:$0xff]  ;;  %v518_v5 = vld [vmem:[%s2460_s3 + $0x18] sm:$0xff] }
   0xd   :  { %v1379_v33 = vpack.c.bf16 %v87_v31, %v83_v30  ;;  %v91_v36 = vld [vmem:[%s2459_s1 + $0x188] sm:$0xff]  ;;  %v1381_v38 = vpack.c.bf16 %v86_v35, %v82_v34  ;;  %v90_v40 = vld [vmem:[%s2459_s1 + $0x180] sm:$0xff]  ;;  %v60_v10 = vld [vmem:[%s2459_s1 + $0x90] sm:$0xff]  ;;  %v1427_v14 = vpack.c.bf16 %v518_v5, %v517_v4 }
   0xe   :  { %1370 = vmatpush1.bf16.msra.mxu0 %v1369_v20  ;;  %1529 = vmatpush1.bf16.msra.mxu1 %v1369_v20  ;;  %v95_v37 = vld [vmem:[%s2459_s1 + $0x1a8] sm:$0xff]  ;;  %v94_v41 = vld [vmem:[%s2459_s1 + $0x1a0] sm:$0xff]  ;;  %v64_v11 = vld [vmem:[%s2459_s1 + $0xb0] sm:$0xff] }
   0xf   :  { %1372 = vmatprep.subr.bf16.mxu0 %v1371_v21  ;;  %1522 = vmatprep.subr.bf16.mxu1 %v1371_v21  ;;  %v1383_v39 = vpack.c.bf16 %v95_v37, %v91_v36  ;;  %v99_v42 = vld [vmem:[%s2459_s1 + $0x1c8] sm:$0xff]  ;;  %v1385_v44 = vpack.c.bf16 %v94_v41, %v90_v40  ;;  %v98_v46 = vld [vmem:[%s2459_s1 + $0x1c0] sm:$0xff]  ;;  %v69_v12 = vld [vmem:[%s2459_s1 + $0xd8] sm:$0xff]  ;;  %v1401_v17 = vpack.c.bf16 %v64_v11, %v60_v10 }
  0x10   :  { %v103_v43 = vld [vmem:[%s2459_s1 + $0x1e8] sm:$0xff]  ;;  %v102_v47 = vld [vmem:[%s2459_s1 + $0x1e0] sm:$0xff]  ;;  %v73_v13 = vld [vmem:[%s2459_s1 + $0xf8] sm:$0xff] }
  0x11   :  { %v1387_v45 = vpack.c.bf16 %v103_v43, %v99_v42  ;;  %v515_v50 = vld [vmem:[%s2460_s3] sm:$0xff]  ;;  %v516_v51 = vld [vmem:[%s2460_s3 + $0x8] sm:$0xff]  ;;  %v1389_v52 = vpack.c.bf16 %v102_v47, %v98_v46  ;;  %v1764_v15 = vld [vmem:[%s2461_s0 + $0x10] sm:$0xff]  ;;  %v1403_v18 = vpack.c.bf16 %v73_v13, %v69_v12 }
  0x12   :  { %1374 = vmatpush1.bf16.msra.mxu0 %v1373_v26  ;;  %1530 = vmatpush1.bf16.msra.mxu1 %v1373_v26  ;;  %v1423_v56 = vpack.c.bf16 %v516_v51, %v515_v50  ;;  %v1707_v59 = vld [vmem:[%s2461_s0] sm:$0xff]  ;;  %v1738_v6 = vld [vmem:[%s2461_s0 + $0x8] sm:$0xff]  ;;  %v1769_v16 = vld [vmem:[%s2461_s0 + $0x50] sm:$0xff] }
  0x13   :  { %1376 = vmatprep.subr.bf16.mxu0 %v1375_v27  ;;  %1523 = vmatprep.subr.bf16.mxu1 %v1375_v27  ;;  %v1712_v60 = vld [vmem:[%s2461_s0 + $0x40] sm:$0xff]  ;;  %v1743_v7 = vld [vmem:[%s2461_s0 + $0x48] sm:$0xff]  ;;  %v68_v19 = vld [vmem:[%s2459_s1 + $0xd0] sm:$0xff] }
  0x14   :  { %v72_v20 = vld [vmem:[%s2459_s1 + $0xf0] sm:$0xff]  ;;  %v77_v21 = vld [vmem:[%s2459_s1 + $0x118] sm:$0xff]  ;;  %v519_v23 = vld [vmem:[%s2460_s3 + $0x20] sm:$0xff] }
  0x15   :  { %v81_v22 = vld [vmem:[%s2459_s1 + $0x138] sm:$0xff]  ;;  %v520_v24 = vld [vmem:[%s2460_s3 + $0x28] sm:$0xff]  ;;  %v1405_v27 = vpack.c.bf16 %v72_v20, %v68_v19  ;;  %v76_v29 = vld [vmem:[%s2459_s1 + $0x110] sm:$0xff] }
  0x16   :  { %1378 = vmatpush1.bf16.msra.mxu0 %v1377_v32  ;;  %1531 = vmatpush1.bf16.msra.mxu1 %v1377_v32  ;;  %v1796_v25 = vld [vmem:[%s2461_s0 + $0x18] sm:$0xff]  ;;  %v1407_v28 = vpack.c.bf16 %v81_v22, %v77_v21  ;;  %v80_v30 = vld [vmem:[%s2459_s1 + $0x130] sm:$0xff]  ;;  %v1822_v34 = vld [vmem:[%s2461_s0 + $0x20] sm:$0xff] }
  0x17   :  { %1380 = vmatprep.subr.bf16.mxu0 %v1379_v33  ;;  %1524 = vmatprep.subr.bf16.mxu1 %v1379_v33  ;;  %v1801_v26 = vld [vmem:[%s2461_s0 + $0x58] sm:$0xff]  ;;  %v1431_v33 = vpack.c.bf16 %v520_v24, %v519_v23  ;;  %v1827_v35 = vld [vmem:[%s2461_s0 + $0x60] sm:$0xff]  ;;  %v1409_v36 = vpack.c.bf16 %v80_v30, %v76_v29  ;;  %v521_v42 = vld [vmem:[%s2460_s3 + $0x30] sm:$0xff] }
  0x18   :  { %v85_v31 = vld [vmem:[%s2459_s1 + $0x158] sm:$0xff]  ;;  %v92_v48 = vld [vmem:[%s2459_s1 + $0x190] sm:$0xff]  ;;  %v523_v63 = vld [vmem:[%s2460_s3 + $0x40] sm:$0xff] }
  0x19   :  { %v89_v32 = vld [vmem:[%s2459_s1 + $0x178] sm:$0xff]  ;;  %v96_v49 = vld [vmem:[%s2459_s1 + $0x1b0] sm:$0xff]  ;;  %v524_v0 = vld [vmem:[%s2460_s3 + $0x48] sm:$0xff] }
  0x1a   :  { %1382 = vmatpush1.bf16.msra.mxu0 %v1381_v38  ;;  %1532 = vmatpush1.bf16.msra.mxu1 %v1381_v38  ;;  %v1411_v37 = vpack.c.bf16 %v89_v32, %v85_v31  ;;  %v84_v38 = vld [vmem:[%s2459_s1 + $0x150] sm:$0xff]  ;;  %v93_v40 = vld [vmem:[%s2459_s1 + $0x198] sm:$0xff]  ;;  %v1417_v55 = vpack.c.bf16 %v96_v49, %v92_v48  ;;  %v1439_v10 = vpack.c.bf16 %v524_v0, %v523_v63  ;;  %v1095_v22 = vld [vmem:[%s2460_s3 + $0xc0] sm:$0xff] }
  0x1b   :  { %1384 = vmatprep.subr.bf16.mxu0 %v1383_v39  ;;  %1525 = vmatprep.subr.bf16.mxu1 %v1383_v39  ;;  %v88_v39 = vld [vmem:[%s2459_s1 + $0x170] sm:$0xff]  ;;  %v97_v41 = vld [vmem:[%s2459_s1 + $0x1b8] sm:$0xff]  ;;  %v1096_v23 = vld [vmem:[%s2460_s3 + $0xc8] sm:$0xff] }
  0x1c   :  { %v522_v43 = vld [vmem:[%s2460_s3 + $0x38] sm:$0xff]  ;;  %v1413_v46 = vpack.c.bf16 %v88_v39, %v84_v38  ;;  %v1415_v47 = vpack.c.bf16 %v97_v41, %v93_v40  ;;  %v1885_v54 = vld [vmem:[%s2461_s0 + $0x70] sm:$0xff]  ;;  %v108_v38 = vlaneseq  ;;  %v2022_v40 = vld [vmem:[%s2463_s2] sm:$0xf] }
  0x1d   :  { %v101_v50 = vld [vmem:[%s2459_s1 + $0x1d8] sm:$0xff]  ;;  %v100_v57 = vld [vmem:[%s2459_s1 + $0x1d0] sm:$0xff] }
  0x1e   :  { %1386 = vmatpush1.bf16.msra.mxu0 %v1385_v44  ;;  %1533 = vmatpush1.bf16.msra.mxu1 %v1385_v44  ;;  %v1854_v44 = vld [vmem:[%s2461_s0 + $0x28] sm:$0xff]  ;;  %v105_v51 = vld [vmem:[%s2459_s1 + $0x1f8] sm:$0xff]  ;;  %v104_v58 = vld [vmem:[%s2459_s1 + $0x1f0] sm:$0xff]  ;;  %v2016_v39 = vshrl.u32 %v108_v38, 7 }
  0x1f   :  { %1388 = vmatprep.subr.bf16.mxu0 %v1387_v45  ;;  %1526 = vmatprep.subr.bf16.mxu1 %v1387_v45  ;;  %v1859_v45 = vld [vmem:[%s2461_s0 + $0x68] sm:$0xff]  ;;  %v33_v1 = vld [vmem:[%s2461_s0 + $0x38] sm:$0xff]  ;;  %v1421_v4 = vpack.c.bf16 %v104_v58, %v100_v57  ;;  %v525_v5 = vld [vmem:[%s2460_s3 + $0x50] sm:$0xff] }
  0x20   :  { %v1915_v2 = vld [vmem:[%s2461_s0 + $0x78] sm:$0xff]  ;;  %v1089_v11 = vld [vmem:[%s2460_s3 + $0x90] sm:$0xff]  ;;  %v114_v41 = vsub.s32 1, %v2016_v39 }
  0x21   :  { %v1090_v12 = vld [vmem:[%s2460_s3 + $0x98] sm:$0xff]  ;;  %v1093_v20 = vld [vmem:[%s2460_s3 + $0xb0] sm:$0xff] }
  0x22   :  { %1390 = vmatpush1.bf16.msra.mxu0 %v1389_v52  ;;  %1534 = vmatpush1.bf16.msra.mxu1 %v1389_v52  ;;  %v1435_v52 = vpack.c.bf16 %v522_v43, %v521_v42  ;;  %v1094_v21 = vld [vmem:[%s2460_s3 + $0xb8] sm:$0xff]  ;;  %v1097_v24 = vld [vmem:[%s2460_s3 + $0xd0] sm:$0xff]  ;;  %v2033_v43 = vrot.slane %v2022_v40, %v114_v41 }
  0x23   :  { %1392 = vmatprep.subr.bf16.mxu1 %v1391_v53  ;;  %1424 = vmatprep.subr.bf16.mxu0 %v1423_v56  ;;  %v1880_v53 = vld [vmem:[%s2461_s0 + $0x30] sm:$0xff]  ;;  %v530_v30 = vld [vmem:[%s2460_s3 + $0x78] sm:$0xff] }
  0x24   :  { %v529_v29 = vld [vmem:[%s2460_s3 + $0x70] sm:$0xff]  ;;  %v897_v57 = vld [vmem:[%s2462_s4 + $0x98] sm:$0xff] }
  0x25   :  { %193 = vmatmul.mubr.f32.vlgmr.msra.gmra.mrb[0].mxu0 %v1707_v59  ;;  %241 = vmatmul.mubr.f32.vlgmr.msra.gmra.mrb[0].mxu1 %v1712_v60  ;;  %v1451_v31 = vpack.c.bf16 %v530_v30, %v529_v29  ;;  %v1101_v32 = vld [vmem:[%s2460_s3 + $0xf0] sm:$0xff] }
  0x26   :  { %198 = vmatprep.mubr.f32.mxu0 %v1536_v3  ;;  %1394 = vmatpush1.bf16.msra.mxu1 %v1393_v61  ;;  %v1087_v61 = vld [vmem:[%s2460_s3 + $0x80] sm:$0xff]  ;;  %v884_v30 = vld [vmem:[%s2462_s4 + $0x30] sm:$0xff] }
  0x27   :  { %246 = vmatprep.mubr.f32.mxu1 %v1536_v3  ;;  %1396 = vmatprep.subr.bf16.mxu1 %v1395_v62  ;;  %v1088_v62 = vld [vmem:[%s2460_s3 + $0x88] sm:$0xff] }
  0x28   :  { %1426 = vmatpush3.bf16.msra.mxu0 %v1423_v56  ;;  %v1419_v56 = vpack.c.bf16 %v105_v51, %v101_v50  ;;  %v878_v51 = vld [vmem:[%s2462_s4] sm:$0xff] }
  0x29   :  { %199 = vmatmul.mubr.f32.gmra.mrb[2].mxu0 %v1738_v6  ;;  %247 = vmatmul.mubr.f32.gmra.mrb[2].mxu1 %v1743_v7 }
  0x2a   :  { %204 = vmatprep.mubr.f32.mxu0 %v1536_v3  ;;  %1398 = vmatpush1.bf16.msra.mxu1 %v1397_v8  ;;  %v526_v8 = vld [vmem:[%s2460_s3 + $0x58] sm:$0xff] }
  0x2b   :  { %252 = vmatprep.mubr.f32.mxu1 %v1536_v3  ;;  %1400 = vmatprep.subr.bf16.mxu1 %v1399_v9  ;;  %v1455_v9 = vpack.c.bf16 %v1088_v62, %v1087_v61  ;;  %v1443_v13 = vpack.c.bf16 %v526_v8, %v525_v5  ;;  %v881_v5 = vld [vmem:[%s2462_s4 + $0x18] sm:$0xff] }
  0x2c   :  { %1428 = vmatprep.subr.bf16.mxu0 %v1427_v14 }
  0x2d   :  { %205 = vmatmul.mubr.f32.gmra.mrb[4].mxu0 %v1764_v15  ;;  %253 = vmatmul.mubr.f32.gmra.mrb[4].mxu1 %v1769_v16 }
  0x2e   :  { %210 = vmatprep.mubr.f32.mxu0 %v1536_v3  ;;  %1402 = vmatpush1.bf16.msra.mxu1 %v1401_v17  ;;  %v1091_v17 = vld [vmem:[%s2460_s3 + $0xa0] sm:$0xff] }
  0x2f   :  { %258 = vmatprep.mubr.f32.mxu1 %v1536_v3  ;;  %1404 = vmatprep.subr.bf16.mxu1 %v1403_v18  ;;  %v1092_v18 = vld [vmem:[%s2460_s3 + $0xa8] sm:$0xff] }
  0x30   :  { %1430 = vmatpush3.bf16.msra.mxu0 %v1427_v14  ;;  %v1459_v14 = vpack.c.bf16 %v1090_v12, %v1089_v11  ;;  %v1463_v19 = vpack.c.bf16 %v1092_v18, %v1091_v17  ;;  %v898_v11 = vld [vmem:[%s2462_s4 + $0xa0] sm:$0xff]  ;;  %v899_v12 = vld [vmem:[%s2462_s4 + $0xa8] sm:$0xff] }
  0x31   :  { %211 = vmatmul.mubr.f32.gmra.mrb[6].mxu0 %v1796_v25  ;;  %259 = vmatmul.mubr.f32.gmra.mrb[6].mxu1 %v1801_v26 }
  0x32   :  { %216 = vmatprep.mubr.f32.mxu0 %v1536_v3  ;;  %1406 = vmatpush1.bf16.msra.mxu1 %v1405_v27  ;;  %v1098_v27 = vld [vmem:[%s2460_s3 + $0xd8] sm:$0xff] }
  0x33   :  { %264 = vmatprep.mubr.f32.mxu1 %v1536_v3  ;;  %1408 = vmatprep.subr.bf16.mxu1 %v1407_v28 }
  0x34   :  { %1432 = vmatprep.subr.bf16.mxu0 %v1431_v33 }
  0x35   :  { %217 = vmatmul.mubr.f32.gmra.mrb[8].mxu0 %v1822_v34  ;;  %265 = vmatmul.mubr.f32.gmra.mrb[8].mxu1 %v1827_v35 }
  0x36   :  { %222 = vmatprep.mubr.f32.mxu0 %v1536_v3  ;;  %1410 = vmatpush1.bf16.msra.mxu1 %v1409_v36  ;;  %v895_v36 = vld [vmem:[%s2462_s4 + $0x88] sm:$0xff] }
  0x37   :  { %270 = vmatprep.mubr.f32.mxu1 %v1536_v3  ;;  %1412 = vmatprep.subr.bf16.mxu1 %v1411_v37 }
  0x38   :  { %1434 = vmatpush3.bf16.msra.mxu0 %v1431_v33  ;;  %v1102_v33 = vld [vmem:[%s2460_s3 + $0xf8] sm:$0xff] }
  0x39   :  { %223 = vmatmul.mubr.f32.gmra.mrb[10].mxu0 %v1854_v44  ;;  %271 = vmatmul.mubr.f32.gmra.mrb[10].mxu1 %v1859_v45 }
  0x3a   :  { %228 = vmatprep.mubr.f32.mxu0 %v1536_v3  ;;  %1414 = vmatpush1.bf16.msra.mxu1 %v1413_v46 }
  0x3b   :  { %276 = vmatprep.mubr.f32.mxu1 %v1536_v3  ;;  %1416 = vmatprep.subr.bf16.mxu1 %v1415_v47 }
  0x3c   :  { %1436 = vmatprep.subr.bf16.mxu0 %v1435_v52 }
  0x3d   :  { %229 = vmatmul.mubr.f32.gmra.mrb[12].mxu0 %v1880_v53  ;;  %277 = vmatmul.mubr.f32.gmra.mrb[12].mxu1 %v1885_v54 }
  0x3e   :  { %234 = vmatprep.mubr.f32.mxu0 %v1536_v3  ;;  %1418 = vmatpush1.bf16.msra.mxu1 %v1417_v55 }
  0x3f   :  { %282 = vmatprep.mubr.f32.mxu1 %v1536_v3  ;;  %1420 = vmatprep.subr.bf16.mxu1 %v1419_v56  ;;  %v896_v56 = vld [vmem:[%s2462_s4 + $0x90] sm:$0xff] }
  0x40   :  { %1438 = vmatpush3.bf16.msra.mxu0 %v1435_v52  ;;  %v879_v52 = vld [vmem:[%s2462_s4 + $0x8] sm:$0xff] }
  0x41   :  { %235 = vmatmul.mubr.f32.gmra.mrb[14].mxu0 %v33_v1  ;;  %283 = vmatmul.mubr.f32.gmra.mrb[14].mxu1 %v1915_v2  ;;  %v1489_v0 = vpack.c.bf16 %v879_v52, %v878_v51  ;;  %v886_v51 = vld [vmem:[%s2462_s4 + $0x40] sm:$0xff]  ;;  %v887_v52 = vld [vmem:[%s2462_s4 + $0x48] sm:$0xff] }
  0x42   :  { %1422 = vmatpush1.bf16.msra.mxu1 %v1421_v4  ;;  %353 = vmatprep.mubr.f32.mxu1 %v1536_v3  ;;  %v880_v4 = vld [vmem:[%s2462_s4 + $0x10] sm:$0xff] }
  0x43   :  { %1456 = vmatprep.subr.bf16.mxu1 %v1455_v9  ;;  %1440 = vmatprep.subr.bf16.mxu0 %v1439_v10 }
  0x44   :  { %1442 = vmatpush3.bf16.msra.mxu0 %v1439_v10 }
  0x45   :  { %354 = vmatmul.mubr.f32.vlgmr.msra.gmra.mrb[16].mxu1 %v1707_v59  ;;  %1444 = vmatprep.subr.bf16.mxu0 %v1443_v13  ;;  %v1467_v59 = vpack.c.bf16 %v1094_v21, %v1093_v20  ;;  %v1495_v21 = vpack.c.bf16 %v899_v12, %v898_v11 }
  0x46   :  { %359 = vmatprep.mubr.f32.mxu1 %v1536_v3  ;;  %1458 = vmatpush3.bf16.msra.mxu1 %v1455_v9 }
  0x47   :  { %1460 = vmatprep.subr.bf16.mxu1 %v1459_v14 }
  0x48   :  { %1446 = vmatpush3.bf16.msra.mxu0 %v1443_v13 }
  0x49   :  { %360 = vmatmul.mubr.f32.gmra.mrb[18].mxu1 %v1738_v6  ;;  %v1471_v6 = vpack.c.bf16 %v1096_v23, %v1095_v22  ;;  %v883_v22 = vld [vmem:[%s2462_s4 + $0x28] sm:$0xff] }
  0x4a   :  { %365 = vmatprep.mubr.f32.mxu1 %v1536_v3  ;;  %1462 = vmatpush3.bf16.msra.mxu1 %v1459_v14 }
  0x4b   :  { %1464 = vmatprep.subr.bf16.mxu1 %v1463_v19 }
  0x4d   :  { %366 = vmatmul.mubr.f32.gmra.mrb[20].mxu1 %v1764_v15  ;;  %v1475_v15 = vpack.c.bf16 %v1098_v27, %v1097_v24  ;;  %v900_v27 = vld [vmem:[%s2462_s4 + $0xb0] sm:$0xff] }
  0x4e   :  { %371 = vmatprep.mubr.f32.mxu1 %v1536_v3  ;;  %1466 = vmatpush3.bf16.msra.mxu1 %v1463_v19  ;;  %v1493_v19 = vpack.c.bf16 %v881_v5, %v880_v4 }
  0x4f   :  { %1468 = vmatprep.subr.bf16.mxu1 %v1467_v59 }
  0x51   :  { %372 = vmatmul.mubr.f32.gmra.mrb[22].mxu1 %v1796_v25 }
  0x52   :  { %377 = vmatprep.mubr.f32.mxu1 %v1536_v3  ;;  %1470 = vmatpush3.bf16.msra.mxu1 %v1467_v59  ;;  %v882_v59 = vld [vmem:[%s2462_s4 + $0x20] sm:$0xff] }
  0x53   :  { %1472 = vmatprep.subr.bf16.mxu1 %v1471_v6 }
  0x55   :  { %378 = vmatmul.mubr.f32.gmra.mrb[24].mxu1 %v1822_v34  ;;  %v1483_v34 = vpack.c.bf16 %v1102_v33, %v1101_v32 }
  0x56   :  { %383 = vmatprep.mubr.f32.mxu1 %v1536_v3  ;;  %1474 = vmatpush3.bf16.msra.mxu1 %v1471_v6 }
  0x57   :  { %1476 = vmatprep.subr.bf16.mxu1 %v1475_v15 }
  0x59   :  { %384 = vmatmul.mubr.f32.gmra.mrb[26].mxu1 %v1854_v44 }
  0x5a   :  { %389 = vmatprep.mubr.f32.mxu1 %v1536_v3  ;;  %1478 = vmatpush3.bf16.msra.mxu1 %v1475_v15  ;;  %v901_v15 = vld [vmem:[%s2462_s4 + $0xb8] sm:$0xff] }
  0x5b   :  { %v1499_v29 = vpack.c.bf16 %v901_v15, %v900_v27  ;;  %v890_v27 = vld [vmem:[%s2462_s4 + $0x60] sm:$0xff] }
  0x5d   :  { %390 = vmatmul.mubr.f32.gmra.mrb[28].mxu1 %v1880_v53 }
  0x5e   :  { %395 = vmatprep.mubr.f32.mxu1 %v1536_v3 }
  0x61   :  { %396 = vmatmul.mubr.f32.gmra.mrb[30].mxu1 %v33_v1 }
  0x62   :  { %401 = vmatprep.mubr.f32.mxu1 %v1536_v3 }
  0x65   :  { %402 = vmatmul.mubr.f32.gmra.mrb[32].mxu1 %v1712_v60  ;;  %v527_v60 = vld [vmem:[%s2460_s3 + $0x60] sm:$0xff] }
  0x66   :  { %407 = vmatprep.mubr.f32.mxu1 %v1536_v3 }
  0x69   :  { %408 = vmatmul.mubr.f32.gmra.mrb[34].mxu1 %v1743_v7  ;;  %v528_v7 = vld [vmem:[%s2460_s3 + $0x68] sm:$0xff] }
  0x6a   :  { %413 = vmatprep.mubr.f32.mxu1 %v1536_v3  ;;  %v1447_v25 = vpack.c.bf16 %v528_v7, %v527_v60 }
  0x6c   :  { %1448 = vmatprep.subr.bf16.mxu0 %v1447_v25 }
  0x6d   :  { %414 = vmatmul.mubr.f32.gmra.mrb[36].mxu1 %v1769_v16  ;;  %v1099_v16 = vld [vmem:[%s2460_s3 + $0xe0] sm:$0xff]  ;;  %1450 = vmatpush3.bf16.msra.mxu0 %v1447_v25 }
  0x6e   :  { %419 = vmatprep.mubr.f32.mxu1 %v1536_v3  ;;  %1452 = vmatprep.subr.bf16.mxu0 %v1451_v31 }
  0x71   :  { %420 = vmatmul.mubr.f32.gmra.mrb[38].mxu1 %v1801_v26  ;;  %v1100_v26 = vld [vmem:[%s2460_s3 + $0xe8] sm:$0xff]  ;;  %1454 = vmatpush3.bf16.msra.mxu0 %v1451_v31  ;;  %v885_v31 = vld [vmem:[%s2462_s4 + $0x38] sm:$0xff] }
  0x72   :  { %425 = vmatprep.mubr.f32.mxu1 %v1536_v3  ;;  %v1479_v28 = vpack.c.bf16 %v1100_v26, %v1099_v16  ;;  %v1497_v26 = vpack.c.bf16 %v883_v22, %v882_v59 }
  0x74   :  { %1480 = vmatprep.subr.bf16.mxu1 %v1479_v28 }
  0x75   :  { %426 = vmatmul.mubr.f32.gmra.mrb[40].mxu1 %v1827_v35  ;;  %v894_v35 = vld [vmem:[%s2462_s4 + $0x80] sm:$0xff] }
  0x76   :  { %431 = vmatprep.mubr.f32.mxu1 %v1536_v3  ;;  %1482 = vmatpush3.bf16.msra.mxu1 %v1479_v28  ;;  %v1487_v37 = vpack.c.bf16 %v895_v36, %v894_v35  ;;  %v902_v35 = vld [vmem:[%s2462_s4 + $0xc0] sm:$0xff]  ;;  %v903_v36 = vld [vmem:[%s2462_s4 + $0xc8] sm:$0xff] }
  0x77   :  { %1484 = vmatprep.subr.bf16.mxu1 %v1483_v34 }
  0x78   :  { %1488 = vmatprep.subr.bf16.mxu0 %v1487_v37 }
  0x79   :  { %432 = vmatmul.mubr.f32.gmra.mrb[42].mxu1 %v1859_v45 }
  0x7a   :  { %437 = vmatprep.mubr.f32.mxu1 %v1536_v3  ;;  %1486 = vmatpush3.bf16.msra.mxu1 %v1483_v34 }
  0x7d   :  { %438 = vmatmul.mubr.f32.gmra.mrb[44].mxu1 %v1885_v54 }
  0x7e   :  { %443 = vmatprep.mubr.f32.mxu1 %v1536_v3  ;;  %v110_v3 = vsub.s32 0, %v2016_v39 }
  0x80   :  { %v2028_v42 = vrot.slane %v2022_v40, %v110_v3 }
  0x81   :  { %444 = vmatmul.mubr.f32.gmra.mrb[46].mxu1 %v1915_v2  ;;  %v1491_v2 = vpack.c.bf16 %v897_v57, %v896_v56  ;;  %v904_v57 = vld [vmem:[%s2462_s4 + $0xd0] sm:$0xff] }
  0xf8   :  { %v194_v44 = vpop.f32.mrb[0].mxu0  ;;  %v2035_v45 = vpop.f32.mrb[0].mxu1 }
  0xf9   :  { %v195_v46 = vadd.f32 %v194_v44, %v2028_v42  ;;  %v196_v47 = vpop.f32.mrb[1].mxu0  ;;  %v2038_v48 = vpop.f32.mrb[1].mxu1  ;;  %v243_v15 = vadd.f32 %v2035_v45, %v2028_v42 }
  0xfa   :  { %v197_v49 = vadd.f32 %v196_v47, %v2033_v43  ;;  %v1501_v47 = vpack.c.bf16 %v885_v31, %v884_v30  ;;  %v245_v30 = vadd.f32 %v2038_v48, %v2033_v43 }
  0xfb   :  { %v450_v50 = vmax.f32 %v195_v46, 0.0 }
  0xfc   :  { %v451_v53 = vmax.f32 %v197_v49, 0.0  ;;  %v200_v54 = vpop.f32.mrb[2].mxu0  ;;  %v2047_v55 = vpop.f32.mrb[2].mxu1 }
  0xfd   :  { %v201_v58 = vadd.f32 %v200_v54, %v2028_v42  ;;  %v202_v61 = vpop.f32.mrb[3].mxu0  ;;  %1279 = vmatprep.mubr.f32.mxu0 %v450_v50  ;;  %v2056_v62 = vpop.f32.mrb[3].mxu1  ;;  %v1503_v50 = vpack.c.bf16 %v903_v36, %v902_v35  ;;  %v249_v35 = vadd.f32 %v2047_v55, %v2028_v42  ;;  %v893_v55 = vld [vmem:[%s2462_s4 + $0x78] sm:$0xff] }
  0xfe   :  { %v203_v63 = vadd.f32 %v202_v61, %v2033_v43  ;;  %1335 = vmatprep.mubr.f32.mxu1 %v451_v53  ;;  %v251_v48 = vadd.f32 %v2056_v62, %v2033_v43  ;;  %v122_v62 = vsub.s32 3, %v2016_v39 }
  0xff   :  { %v454_v1 = vmax.f32 %v201_v58, 0.0  ;;  %v905_v58 = vld [vmem:[%s2462_s4 + $0xd8] sm:$0xff] }
 0x100   :  { %v455_v8 = vmax.f32 %v203_v63, 0.0  ;;  %v206_v9 = vpop.f32.mrb[4].mxu0  ;;  %v2065_v10 = vpop.f32.mrb[4].mxu1  ;;  %v1507_v5 = vpack.c.bf16 %v905_v58, %v904_v57 }
 0x101   :  { %v207_v13 = vadd.f32 %v206_v9, %v2028_v42  ;;  %v208_v14 = vpop.f32.mrb[5].mxu0  ;;  %1280 = vmatmul.mubr.f32.vlgmr.msra.gmra.mrb[16].mxu0 %v454_v1  ;;  %v2074_v17 = vpop.f32.mrb[5].mxu1  ;;  %v889_v9 = vld [vmem:[%s2462_s4 + $0x58] sm:$0xff] }
 0x102   :  { %v209_v18 = vadd.f32 %v208_v14, %v2033_v43  ;;  %1336 = vmatmul.mubr.f32.vlgmr.msra.gmra.mrb[48].mxu1 %v455_v8  ;;  %1490 = vmatpush3.bf16.msra.mxu0 %v1489_v0  ;;  %v888_v8 = vld [vmem:[%s2462_s4 + $0x50] sm:$0xff]  ;;  %v906_v14 = vld [vmem:[%s2462_s4 + $0xe0] sm:$0xff] }
 0x103   :  { %v458_v20 = vmax.f32 %v207_v13, 0.0  ;;  %1492 = vmatprep.subr.bf16.mxu0 %v1491_v2  ;;  %v1505_v2 = vpack.c.bf16 %v887_v52, %v886_v51  ;;  %v1509_v22 = vpack.c.bf16 %v889_v9, %v888_v8  ;;  %v892_v51 = vld [vmem:[%s2462_s4 + $0x70] sm:$0xff]  ;;  %v483_v52 = vmax.f32 %v245_v30, 0.0 }
 0x104   :  { %v459_v23 = vmax.f32 %v209_v18, 0.0  ;;  %v212_v6 = vpop.f32.mrb[6].mxu0  ;;  %v2083_v24 = vpop.f32.mrb[6].mxu1  ;;  %v907_v18 = vld [vmem:[%s2462_s4 + $0xe8] sm:$0xff]  ;;  %v1517_v58 = vpack.c.bf16 %v893_v55, %v892_v51 }
 0x105   :  { %v213_v60 = vadd.f32 %v212_v6, %v2028_v42  ;;  %v214_v7 = vpop.f32.mrb[7].mxu0  ;;  %1282 = vmatprep.mubr.f32.mxu0 %v458_v20  ;;  %v2092_v25 = vpop.f32.mrb[7].mxu1  ;;  %v1511_v6 = vpack.c.bf16 %v907_v18, %v906_v14  ;;  %v261_v57 = vadd.f32 %v2083_v24, %v2028_v42  ;;  %v2195_v24 = vrot.slane %v2022_v40, %v122_v62 }
 0x106   :  { %v215_v16 = vadd.f32 %v214_v7, %v2033_v43  ;;  %1338 = vmatprep.mubr.f32.mxu1 %v459_v23  ;;  %1494 = vmatpush3.bf16.msra.mxu0 %v1493_v19 }
 0x107   :  { %v462_v28 = vmax.f32 %v213_v60, 0.0  ;;  %1496 = vmatprep.subr.bf16.mxu0 %v1495_v21  ;;  %v494_v9 = vmax.f32 %v261_v57, 0.0 }
 0x108   :  { %v463_v32 = vmax.f32 %v215_v16, 0.0  ;;  %v218_v33 = vpop.f32.mrb[8].mxu0  ;;  %v2101_v34 = vpop.f32.mrb[8].mxu1 }
 0x109   :  { %v219_v37 = vadd.f32 %v218_v33, %v2028_v42  ;;  %v220_v38 = vpop.f32.mrb[9].mxu0  ;;  %1283 = vmatmul.mubr.f32.gmra.mrb[18].mxu0 %v462_v28  ;;  %v2110_v44 = vpop.f32.mrb[9].mxu1  ;;  %v908_v28 = vld [vmem:[%s2462_s4 + $0xf0] sm:$0xff] }
 0x10a   :  { %v221_v46 = vadd.f32 %v220_v38, %v2033_v43  ;;  %1339 = vmatmul.mubr.f32.gmra.mrb[50].mxu1 %v463_v32  ;;  %1498 = vmatpush3.bf16.msra.mxu0 %v1497_v26  ;;  %v891_v26 = vld [vmem:[%s2462_s4 + $0x68] sm:$0xff] }
 0x10b   :  { %v466_v49 = vmax.f32 %v219_v37, 0.0  ;;  %1500 = vmatprep.subr.bf16.mxu0 %v1499_v29  ;;  %v909_v29 = vld [vmem:[%s2462_s4 + $0xf8] sm:$0xff]  ;;  %v1513_v37 = vpack.c.bf16 %v891_v26, %v890_v27 }
 0x10c   :  { %v467_v53 = vmax.f32 %v221_v46, 0.0  ;;  %v224_v54 = vpop.f32.mrb[10].mxu0  ;;  %v2119_v56 = vpop.f32.mrb[10].mxu1  ;;  %v1515_v38 = vpack.c.bf16 %v909_v29, %v908_v28  ;;  %v482_v46 = vmax.f32 %v243_v15, 0.0 }
 0x10d   :  { %v225_v61 = vadd.f32 %v224_v54, %v2028_v42  ;;  %v226_v63 = vpop.f32.mrb[11].mxu0  ;;  %1285 = vmatprep.mubr.f32.mxu0 %v466_v49  ;;  %v2128_v0 = vpop.f32.mrb[11].mxu1 }
 0x10e   :  { %v227_v1 = vadd.f32 %v226_v63, %v2033_v43  ;;  %1341 = vmatprep.mubr.f32.mxu1 %v467_v53  ;;  %1502 = vmatpush3.bf16.msra.mxu0 %v1501_v47  ;;  %v255_v47 = vadd.f32 %v2065_v10, %v2028_v42  ;;  %v257_v53 = vadd.f32 %v2074_v17, %v2033_v43  ;;  %v486_v10 = vmax.f32 %v249_v35, 0.0 }
 0x10f   :  { %v470_v4 = vmax.f32 %v225_v61, 0.0  ;;  %1504 = vmatprep.subr.bf16.mxu0 %v1503_v50  ;;  %v487_v61 = vmax.f32 %v251_v48, 0.0  ;;  %v267_v17 = vadd.f32 %v2101_v34, %v2028_v42  ;;  %v118_v34 = vsub.s32 2, %v2016_v39 }
 0x110   :  { %v471_v11 = vmax.f32 %v227_v1, 0.0  ;;  %v230_v12 = vpop.f32.mrb[12].mxu0  ;;  %v2137_v13 = vpop.f32.mrb[12].mxu1  ;;  %v490_v63 = vmax.f32 %v255_v47, 0.0  ;;  %v263_v1 = vadd.f32 %v2092_v25, %v2033_v43  ;;  %v273_v25 = vadd.f32 %v2119_v56, %v2028_v42 }
 0x111   :  { %v231_v19 = vadd.f32 %v230_v12, %v2028_v42  ;;  %v232_v20 = vpop.f32.mrb[13].mxu0  ;;  %1286 = vmatmul.mubr.f32.gmra.mrb[20].mxu0 %v470_v4  ;;  %v2146_v21 = vpop.f32.mrb[13].mxu1  ;;  %v491_v4 = vmax.f32 %v257_v53, 0.0  ;;  %v498_v12 = vmax.f32 %v267_v17, 0.0  ;;  %v279_v14 = vadd.f32 %v2137_v13, %v2028_v42 }
 0x112   :  { %v233_v59 = vadd.f32 %v232_v20, %v2033_v43  ;;  %1342 = vmatmul.mubr.f32.gmra.mrb[52].mxu1 %v471_v11  ;;  %1506 = vmatpush3.bf16.msra.mxu0 %v1505_v2  ;;  %v495_v11 = vmax.f32 %v263_v1, 0.0  ;;  %v281_v20 = vadd.f32 %v2146_v21, %v2033_v43 }
 0x113   :  { %v474_v23 = vmax.f32 %v231_v19, 0.0  ;;  %1508 = vmatprep.subr.bf16.mxu0 %v1507_v5  ;;  %v269_v5 = vadd.f32 %v2110_v44, %v2033_v43  ;;  %v275_v44 = vadd.f32 %v2128_v0, %v2033_v43  ;;  %v2212_v0 = vrot.slane %v2022_v40, %v118_v34 }
 0x114   :  { %v475_v60 = vmax.f32 %v233_v59, 0.0  ;;  %v236_v7 = vpop.f32.mrb[14].mxu0  ;;  %v2154_v16 = vpop.f32.mrb[14].mxu1  ;;  %v507_v15 = vmax.f32 %v281_v20, 0.0 }
 0x115   :  { %v237_v45 = vadd.f32 %v236_v7, %v2028_v42  ;;  %v238_v31 = vpop.f32.mrb[15].mxu0  ;;  %1288 = vmatprep.mubr.f32.mxu0 %v474_v23  ;;  %v2168_v32 = vpop.f32.mrb[15].mxu1  ;;  %v499_v19 = vmax.f32 %v269_v5, 0.0  ;;  %v285_v23 = vadd.f32 %v2154_v16, %v2028_v42  ;;  %v503_v13 = vmax.f32 %v275_v44, 0.0 }
 0x116   :  { %v239_v33 = vadd.f32 %v238_v31, %v2033_v43  ;;  %1344 = vmatprep.mubr.f32.mxu1 %v475_v60  ;;  %1510 = vmatpush3.bf16.msra.mxu0 %v1509_v22  ;;  %v502_v22 = vmax.f32 %v273_v25, 0.0  ;;  %v287_v21 = vadd.f32 %v2168_v32, %v2033_v43 }
 0x117   :  { %v478_v36 = vmax.f32 %v237_v45, 0.0  ;;  %1512 = vmatprep.subr.bf16.mxu0 %v1511_v6  ;;  %v506_v6 = vmax.f32 %v279_v14, 0.0  ;;  %v510_v16 = vmax.f32 %v285_v23, 0.0 }
 0x118   :  { %v479_v49 = vmax.f32 %v239_v33, 0.0  ;;  %v355_v50 = vpop.f32.mrb[16].mxu1  ;;  %v511_v40 = vmax.f32 %v287_v21, 0.0 }
 0x119   :  { %1289 = vmatmul.mubr.f32.gmra.mrb[22].mxu0 %v478_v36  ;;  %v357_v54 = vpop.f32.mrb[17].mxu1  ;;  %v356_v26 = vadd.f32 %v355_v50, %v2212_v0 }
 0x11a   :  { %1291 = vmatprep.mubr.f32.mxu0 %v482_v46  ;;  %1345 = vmatmul.mubr.f32.gmra.mrb[54].mxu1 %v479_v49  ;;  %v358_v56 = vadd.f32 %v357_v54, %v2195_v24 }
 0x11b   :  { %1347 = vmatprep.mubr.f32.mxu1 %v483_v52  ;;  %1514 = vmatpush3.bf16.msra.mxu0 %v1513_v37  ;;  %v452_v45 = vmax.f32 %v356_v26, 0.0 }
 0x11c   :  { %1516 = vmatprep.subr.bf16.mxu0 %v1515_v38  ;;  %v361_v2 = vpop.f32.mrb[18].mxu1  ;;  %v453_v7 = vmax.f32 %v358_v56, 0.0 }
 0x11d   :  { %1292 = vmatmul.mubr.f32.gmra.mrb[24].mxu0 %v486_v10  ;;  %v363_v8 = vpop.f32.mrb[19].mxu1  ;;  %v362_v31 = vadd.f32 %v361_v2, %v2212_v0 }
 0x11e   :  { %1294 = vmatprep.mubr.f32.mxu0 %v490_v63  ;;  %1348 = vmatmul.mubr.f32.gmra.mrb[56].mxu1 %v487_v61  ;;  %v364_v42 = vadd.f32 %v363_v8, %v2195_v24 }
 0x11f   :  { %1350 = vmatprep.mubr.f32.mxu1 %v491_v4  ;;  %1518 = vmatpush3.bf16.msra.mxu0 %v1517_v58  ;;  %v456_v37 = vmax.f32 %v362_v31, 0.0 }
 0x120   :  { %v367_v18 = vpop.f32.mrb[20].mxu1  ;;  %v457_v30 = vmax.f32 %v364_v42, 0.0 }
 0x121   :  { %1295 = vmatmul.mubr.f32.gmra.mrb[26].mxu0 %v494_v9  ;;  %v369_v59 = vpop.f32.mrb[21].mxu1  ;;  %v368_v38 = vadd.f32 %v367_v18, %v2212_v0 }
 0x122   :  { %1297 = vmatprep.mubr.f32.mxu0 %v498_v12  ;;  %1351 = vmatmul.mubr.f32.gmra.mrb[58].mxu1 %v495_v11  ;;  %v370_v43 = vadd.f32 %v369_v59, %v2195_v24 }
 0x123   :  { %1353 = vmatprep.mubr.f32.mxu1 %v499_v19  ;;  %v460_v50 = vmax.f32 %v368_v38, 0.0 }
 0x124   :  { %v373_v27 = vpop.f32.mrb[22].mxu1  ;;  %v461_v35 = vmax.f32 %v370_v43, 0.0 }
 0x125   :  { %1298 = vmatmul.mubr.f32.gmra.mrb[28].mxu0 %v502_v22  ;;  %v375_v60 = vpop.f32.mrb[23].mxu1  ;;  %v374_v51 = vadd.f32 %v373_v27, %v2212_v0 }
 0x126   :  { %1300 = vmatprep.mubr.f32.mxu0 %v506_v6  ;;  %1354 = vmatmul.mubr.f32.gmra.mrb[60].mxu1 %v503_v13  ;;  %v376_v36 = vadd.f32 %v375_v60, %v2195_v24 }
 0x127   :  { %1356 = vmatprep.mubr.f32.mxu1 %v507_v15  ;;  %v464_v62 = vmax.f32 %v374_v51, 0.0 }
 0x128   :  { %v379_v28 = vpop.f32.mrb[24].mxu1  ;;  %v465_v47 = vmax.f32 %v376_v36, 0.0 }
 0x129   :  { %1301 = vmatmul.mubr.f32.gmra.mrb[30].mxu0 %v510_v16  ;;  %v381_v29 = vpop.f32.mrb[25].mxu1  ;;  %v380_v10 = vadd.f32 %v379_v28, %v2212_v0 }
 0x12a   :  { %1357 = vmatmul.mubr.f32.gmra.mrb[62].mxu1 %v511_v40  ;;  %978 = vmatprep.mubr.f32.mxu0 %v453_v7  ;;  %v382_v49 = vadd.f32 %v381_v29, %v2195_v24 }
 0x12b   :  { %v468_v1 = vmax.f32 %v380_v10, 0.0 }
 0x12c   :  { %v385_v32 = vpop.f32.mrb[26].mxu1  ;;  %v469_v53 = vmax.f32 %v382_v49, 0.0 }
 0x12d   :  { %979 = vmatmul.mubr.f32.vlgmr.msra.gmra.mrb[32].mxu0 %v452_v45  ;;  %v387_v33 = vpop.f32.mrb[27].mxu1  ;;  %v386_v17 = vadd.f32 %v385_v32, %v2212_v0 }
 0x12e   :  { %983 = vmatprep.mubr.f32.mxu0 %v457_v30  ;;  %v388_v54 = vadd.f32 %v387_v33, %v2195_v24 }
 0x12f   :  { %v472_v9 = vmax.f32 %v386_v17, 0.0 }
 0x130   :  { %v391_v46 = vpop.f32.mrb[28].mxu1  ;;  %v473_v61 = vmax.f32 %v388_v54, 0.0 }
 0x131   :  { %984 = vmatmul.mubr.f32.gmra.mrb[34].mxu0 %v456_v37  ;;  %v393_v48 = vpop.f32.mrb[29].mxu1  ;;  %v392_v25 = vadd.f32 %v391_v46, %v2212_v0 }
 0x132   :  { %988 = vmatprep.mubr.f32.mxu0 %v461_v35  ;;  %v394_v63 = vadd.f32 %v393_v48, %v2195_v24 }
 0x133   :  { %v476_v18 = vmax.f32 %v392_v25, 0.0 }
 0x134   :  { %v397_v55 = vpop.f32.mrb[30].mxu1  ;;  %v477_v5 = vmax.f32 %v394_v63, 0.0 }
 0x135   :  { %989 = vmatmul.mubr.f32.gmra.mrb[36].mxu0 %v460_v50  ;;  %v399_v52 = vpop.f32.mrb[31].mxu1  ;;  %v398_v19 = vadd.f32 %v397_v55, %v2212_v0 }
 0x136   :  { %993 = vmatprep.mubr.f32.mxu0 %v465_v47  ;;  %v400_v8 = vadd.f32 %v399_v52, %v2195_v24 }
 0x137   :  { %v480_v23 = vmax.f32 %v398_v19, 0.0 }
 0x138   :  { %v403_v57 = vpop.f32.mrb[32].mxu1  ;;  %v481_v44 = vmax.f32 %v400_v8, 0.0 }
 0x139   :  { %994 = vmatmul.mubr.f32.gmra.mrb[38].mxu0 %v464_v62  ;;  %v405_v58 = vpop.f32.mrb[33].mxu1  ;;  %v404_v13 = vadd.f32 %v403_v57, %v2212_v0 }
 0x13a   :  { %998 = vmatprep.mubr.f32.mxu0 %v469_v53  ;;  %v406_v14 = vadd.f32 %v405_v58, %v2195_v24 }
 0x13b   :  { %v484_v60 = vmax.f32 %v404_v13, 0.0 }
 0x13c   :  { %v409_v2 = vpop.f32.mrb[34].mxu1  ;;  %v485_v56 = vmax.f32 %v406_v14, 0.0 }
 0x13d   :  { %999 = vmatmul.mubr.f32.gmra.mrb[40].mxu0 %v468_v1  ;;  %v411_v4 = vpop.f32.mrb[35].mxu1  ;;  %v410_v7 = vadd.f32 %v409_v2, %v2212_v0 }
 0x13e   :  { %1003 = vmatprep.mubr.f32.mxu0 %v473_v61  ;;  %v412_v22 = vadd.f32 %v411_v4, %v2195_v24  ;;  %v2250_v61 = vld [vmem:[%s2464_s5] sm:$0x7] }
 0x13f   :  { %v488_v28 = vmax.f32 %v410_v7, 0.0  ;;  %v2260_v63 = vrot.slane %v2250_v61, %v114_v41 }
 0x140   :  { %v415_v11 = vpop.f32.mrb[36].mxu1  ;;  %v489_v27 = vmax.f32 %v412_v22, 0.0 }
 0x141   :  { %1004 = vmatmul.mubr.f32.gmra.mrb[42].mxu0 %v472_v9  ;;  %v417_v12 = vpop.f32.mrb[37].mxu1  ;;  %v416_v29 = vadd.f32 %v415_v11, %v2212_v0 }
 0x142   :  { %1008 = vmatprep.mubr.f32.mxu0 %v477_v5  ;;  %v418_v15 = vadd.f32 %v417_v12, %v2195_v24 }
 0x143   :  { %v492_v32 = vmax.f32 %v416_v29, 0.0 }
 0x144   :  { %v421_v20 = vpop.f32.mrb[38].mxu1  ;;  %v493_v26 = vmax.f32 %v418_v15, 0.0 }
 0x145   :  { %1009 = vmatmul.mubr.f32.gmra.mrb[44].mxu0 %v476_v18  ;;  %v423_v59 = vpop.f32.mrb[39].mxu1  ;;  %v422_v33 = vadd.f32 %v421_v20, %v2212_v0 }
 0x146   :  { %1013 = vmatprep.mubr.f32.mxu0 %v481_v44  ;;  %v424_v40 = vadd.f32 %v423_v59, %v2195_v24 }
 0x147   :  { %v496_v46 = vmax.f32 %v422_v33, 0.0 }
 0x148   :  { %v427_v6 = vpop.f32.mrb[40].mxu1  ;;  %v497_v45 = vmax.f32 %v424_v40, 0.0 }
 0x149   :  { %1014 = vmatmul.mubr.f32.gmra.mrb[46].mxu0 %v480_v23  ;;  %v429_v21 = vpop.f32.mrb[41].mxu1  ;;  %v428_v48 = vadd.f32 %v427_v6, %v2212_v0 }
 0x14a   :  { %1018 = vmatprep.mubr.f32.mxu0 %v485_v56  ;;  %v430_v31 = vadd.f32 %v429_v21, %v2195_v24 }
 0x14b   :  { %v500_v50 = vmax.f32 %v428_v48, 0.0 }
 0x14c   :  { %v433_v42 = vpop.f32.mrb[42].mxu1  ;;  %v501_v37 = vmax.f32 %v430_v31, 0.0 }
 0x14d   :  { %1019 = vmatmul.mubr.f32.gmra.mrb[48].mxu0 %v484_v60  ;;  %v435_v16 = vpop.f32.mrb[43].mxu1  ;;  %v434_v51 = vadd.f32 %v433_v42, %v2212_v0 }
 0x14e   :  { %1023 = vmatprep.mubr.f32.mxu0 %v489_v27  ;;  %v436_v38 = vadd.f32 %v435_v16, %v2195_v24 }
 0x14f   :  { %v504_v53 = vmax.f32 %v434_v51, 0.0 }
 0x150   :  { %v439_v30 = vpop.f32.mrb[44].mxu1  ;;  %v505_v47 = vmax.f32 %v436_v38, 0.0 }
 0x151   :  { %1024 = vmatmul.mubr.f32.gmra.mrb[50].mxu0 %v488_v28  ;;  %v441_v43 = vpop.f32.mrb[45].mxu1  ;;  %v440_v54 = vadd.f32 %v439_v30, %v2212_v0 }
 0x152   :  { %1028 = vmatprep.mubr.f32.mxu0 %v493_v26  ;;  %v442_v49 = vadd.f32 %v441_v43, %v2195_v24 }
 0x153   :  { %v508_v10 = vmax.f32 %v440_v54, 0.0 }
 0x154   :  { %v445_v35 = vpop.f32.mrb[46].mxu1  ;;  %v509_v55 = vmax.f32 %v442_v49, 0.0 }
 0x155   :  { %1029 = vmatmul.mubr.f32.gmra.mrb[52].mxu0 %v492_v32  ;;  %v447_v36 = vpop.f32.mrb[47].mxu1  ;;  %v446_v57 = vadd.f32 %v445_v35, %v2212_v0 }
 0x156   :  { %1033 = vmatprep.mubr.f32.mxu0 %v497_v45  ;;  %v448_v52 = vadd.f32 %v447_v36, %v2195_v24  ;;  %v2255_v24 = vrot.slane %v2250_v61, %v110_v3 }
 0x157   :  { %v512_v58 = vmax.f32 %v446_v57, 0.0 }
 0x158   :  { %v513_v62 = vmax.f32 %v448_v52, 0.0 }
 0x159   :  { %1034 = vmatmul.mubr.f32.gmra.mrb[54].mxu0 %v496_v46 }
 0x15a   :  { %1038 = vmatprep.mubr.f32.mxu0 %v501_v37 }
 0x15d   :  { %1039 = vmatmul.mubr.f32.gmra.mrb[56].mxu0 %v500_v50 }
 0x15e   :  { %1043 = vmatprep.mubr.f32.mxu0 %v505_v47 }
 0x161   :  { %1044 = vmatmul.mubr.f32.gmra.mrb[58].mxu0 %v504_v53 }
 0x162   :  { %1048 = vmatprep.mubr.f32.mxu0 %v509_v55 }
 0x165   :  { %1049 = vmatmul.mubr.f32.gmra.mrb[60].mxu0 %v508_v10 }
 0x166   :  { %1053 = vmatprep.mubr.f32.mxu0 %v513_v62 }
 0x169   :  { %1054 = vmatmul.mubr.f32.gmra.mrb[62].mxu0 %v512_v58 }
 0x1d4   :  { %v1281_v0 = vpop.f32.mrb[16].mxu0 }
 0x1d5   :  { %v607_v1 = vadd.f32 %v1281_v0, %v2255_v24  ;;  %v601_v17 = vpop.f32.mrb[17].mxu0  ;;  %v1337_v2 = vpop.f32.mrb[48].mxu1 }
 0x1d6   :  { %v602_v4 = vadd.f32 %v601_v17, %v2255_v24  ;;  %v789_v5 = vadd.f32 %v1337_v2, %v2260_v63  ;;  %v783_v8 = vpop.f32.mrb[49].mxu1 }
 0x1d7   :  { %681 = vst [vmem:[%s2465_s6 + $0x8] sm:$0xff] %v607_v1  ;;  %v784_v3 = vadd.f32 %v783_v8, %v2260_v63 }
 0x1d8   :  { %680 = vst [vmem:[%s2465_s6] sm:$0xff] %v602_v4  ;;  %863 = vst [vmem:[%s2466_s7 + $0x8] sm:$0xff] %v789_v5 }
 0x1d9   :  { %862 = vst [vmem:[%s2466_s7] sm:$0xff] %v784_v3 }
 0x1dc   :  { %v1284_v41 = vpop.f32.mrb[18].mxu0 }
 0x1dd   :  { %v617_v9 = vadd.f32 %v1284_v41, %v2255_v24  ;;  %v611_v25 = vpop.f32.mrb[19].mxu0  ;;  %v1340_v11 = vpop.f32.mrb[50].mxu1 }
 0x1de   :  { %v612_v12 = vadd.f32 %v611_v25, %v2255_v24  ;;  %v799_v44 = vadd.f32 %v1340_v11, %v2260_v63  ;;  %v793_v14 = vpop.f32.mrb[51].mxu1 }
 0x1df   :  { %683 = vst [vmem:[%s2465_s6 + $0x18] sm:$0xff] %v617_v9  ;;  %v794_v18 = vadd.f32 %v793_v14, %v2260_v63 }
 0x1e0   :  { %682 = vst [vmem:[%s2465_s6 + $0x10] sm:$0xff] %v612_v12  ;;  %865 = vst [vmem:[%s2466_s7 + $0x18] sm:$0xff] %v799_v44 }
 0x1e1   :  { %864 = vst [vmem:[%s2466_s7 + $0x10] sm:$0xff] %v794_v18 }
 0x1e4   :  { %v1287_v19 = vpop.f32.mrb[20].mxu0 }
 0x1e5   :  { %v627_v20 = vadd.f32 %v1287_v19, %v2255_v24  ;;  %v621_v59 = vpop.f32.mrb[21].mxu0  ;;  %v1343_v56 = vpop.f32.mrb[52].mxu1 }
 0x1e6   :  { %v622_v22 = vadd.f32 %v621_v59, %v2255_v24  ;;  %v809_v23 = vadd.f32 %v1343_v56, %v2260_v63  ;;  %v803_v13 = vpop.f32.mrb[53].mxu1 }
 0x1e7   :  { %685 = vst [vmem:[%s2465_s6 + $0x28] sm:$0xff] %v627_v20  ;;  %v804_v6 = vadd.f32 %v803_v13, %v2260_v63 }
 0x1e8   :  { %684 = vst [vmem:[%s2465_s6 + $0x20] sm:$0xff] %v622_v22  ;;  %867 = vst [vmem:[%s2466_s7 + $0x28] sm:$0xff] %v809_v23 }
 0x1e9   :  { %866 = vst [vmem:[%s2466_s7 + $0x20] sm:$0xff] %v804_v6 }
 0x1ec   :  { %v1290_v21 = vpop.f32.mrb[22].mxu0 }
 0x1ed   :  { %v637_v27 = vadd.f32 %v1290_v21, %v2255_v24  ;;  %v631_v15 = vpop.f32.mrb[23].mxu0  ;;  %v1346_v60 = vpop.f32.mrb[54].mxu1 }
 0x1ee   :  { %v632_v7 = vadd.f32 %v631_v15, %v2255_v24  ;;  %v819_v42 = vadd.f32 %v1346_v60, %v2260_v63  ;;  %v813_v16 = vpop.f32.mrb[55].mxu1 }
 0x1ef   :  { %687 = vst [vmem:[%s2465_s6 + $0x38] sm:$0xff] %v637_v27  ;;  %v814_v26 = vadd.f32 %v813_v16, %v2260_v63 }
 0x1f0   :  { %686 = vst [vmem:[%s2465_s6 + $0x30] sm:$0xff] %v632_v7  ;;  %869 = vst [vmem:[%s2466_s7 + $0x38] sm:$0xff] %v819_v42  ;;  %v1293_v40 = vpop.f32.mrb[24].mxu0 }
 0x1f1   :  { %868 = vst [vmem:[%s2466_s7 + $0x30] sm:$0xff] %v814_v26  ;;  %v647_v28 = vadd.f32 %v1293_v40, %v2255_v24  ;;  %v641_v29 = vpop.f32.mrb[25].mxu0  ;;  %v1349_v30 = vpop.f32.mrb[56].mxu1 }
 0x1f2   :  { %v642_v43 = vadd.f32 %v641_v29, %v2255_v24  ;;  %v829_v45 = vadd.f32 %v1349_v30, %v2260_v63  ;;  %v823_v31 = vpop.f32.mrb[57].mxu1 }
 0x1f3   :  { %689 = vst [vmem:[%s2465_s6 + $0x48] sm:$0xff] %v647_v28  ;;  %v824_v32 = vadd.f32 %v823_v31, %v2260_v63 }
 0x1f4   :  { %688 = vst [vmem:[%s2465_s6 + $0x40] sm:$0xff] %v642_v43  ;;  %871 = vst [vmem:[%s2466_s7 + $0x48] sm:$0xff] %v829_v45  ;;  %v1296_v33 = vpop.f32.mrb[26].mxu0 }
 0x1f5   :  { %870 = vst [vmem:[%s2466_s7 + $0x40] sm:$0xff] %v824_v32  ;;  %v657_v35 = vadd.f32 %v1296_v33, %v2255_v24  ;;  %v651_v36 = vpop.f32.mrb[27].mxu0  ;;  %v1352_v37 = vpop.f32.mrb[58].mxu1 }
 0x1f6   :  { %v652_v38 = vadd.f32 %v651_v36, %v2255_v24  ;;  %v839_v46 = vadd.f32 %v1352_v37, %v2260_v63  ;;  %v833_v48 = vpop.f32.mrb[59].mxu1 }
 0x1f7   :  { %691 = vst [vmem:[%s2465_s6 + $0x58] sm:$0xff] %v657_v35  ;;  %v834_v47 = vadd.f32 %v833_v48, %v2260_v63 }
 0x1f8   :  { %690 = vst [vmem:[%s2465_s6 + $0x50] sm:$0xff] %v652_v38  ;;  %873 = vst [vmem:[%s2466_s7 + $0x58] sm:$0xff] %v839_v46  ;;  %v1299_v49 = vpop.f32.mrb[28].mxu0 }
 0x1f9   :  { %872 = vst [vmem:[%s2466_s7 + $0x50] sm:$0xff] %v834_v47  ;;  %v667_v50 = vadd.f32 %v1299_v49, %v2255_v24  ;;  %v661_v51 = vpop.f32.mrb[29].mxu0  ;;  %v1355_v55 = vpop.f32.mrb[60].mxu1 }
 0x1fa   :  { %v662_v52 = vadd.f32 %v661_v51, %v2255_v24  ;;  %v849_v53 = vadd.f32 %v1355_v55, %v2260_v63  ;;  %v843_v54 = vpop.f32.mrb[61].mxu1 }
 0x1fb   :  { %693 = vst [vmem:[%s2465_s6 + $0x68] sm:$0xff] %v667_v50  ;;  %v844_v62 = vadd.f32 %v843_v54, %v2260_v63 }
 0x1fc   :  { %692 = vst [vmem:[%s2465_s6 + $0x60] sm:$0xff] %v662_v52  ;;  %875 = vst [vmem:[%s2466_s7 + $0x68] sm:$0xff] %v849_v53  ;;  %v1302_v10 = vpop.f32.mrb[30].mxu0 }
 0x1fd   :  { %874 = vst [vmem:[%s2466_s7 + $0x60] sm:$0xff] %v844_v62  ;;  %v677_v57 = vadd.f32 %v1302_v10, %v2255_v24  ;;  %v671_v58 = vpop.f32.mrb[31].mxu0  ;;  %v1358_v0 = vpop.f32.mrb[62].mxu1 }
 0x1fe   :  { %v672_v1 = vadd.f32 %v671_v58, %v2255_v24  ;;  %v859_v17 = vadd.f32 %v1358_v0, %v2260_v63  ;;  %v853_v2 = vpop.f32.mrb[63].mxu1  ;;  %v2390_v24 = vrot.slane %v2250_v61, %v118_v34 }
 0x1ff   :  { %695 = vst [vmem:[%s2465_s6 + $0x78] sm:$0xff] %v677_v57  ;;  %v854_v4 = vadd.f32 %v853_v2, %v2260_v63 }
 0x200   :  { %694 = vst [vmem:[%s2465_s6 + $0x70] sm:$0xff] %v672_v1  ;;  %877 = vst [vmem:[%s2466_s7 + $0x78] sm:$0xff] %v859_v17  ;;  %v1199_v5 = vpop.f32.mrb[32].mxu0 }
 0x201   :  { %876 = vst [vmem:[%s2466_s7 + $0x70] sm:$0xff] %v854_v4  ;;  %v1200_v8 = vpop.f32.mrb[33].mxu0 }
 0x202   :  { %v1201_v63 = vadd.f32 %v1200_v8, %v1199_v5 }
 0x204   :  { %v981_v3 = vadd.f32 %v1201_v63, %v2390_v24  ;;  %v1202_v41 = vpop.f32.mrb[34].mxu0 }
 0x205   :  { %v1203_v9 = vpop.f32.mrb[35].mxu0 }
 0x206   :  { %1059 = vst [vmem:[%s2467_s8] sm:$0xff] %v981_v3  ;;  %v1204_v25 = vadd.f32 %v1203_v9, %v1202_v41 }
 0x208   :  { %v986_v39 = vadd.f32 %v1204_v25, %v2390_v24  ;;  %v1205_v11 = vpop.f32.mrb[36].mxu0 }
 0x209   :  { %v1206_v34 = vpop.f32.mrb[37].mxu0 }
 0x20a   :  { %1060 = vst [vmem:[%s2467_s8 + $0x8] sm:$0xff] %v986_v39  ;;  %v1207_v61 = vadd.f32 %v1206_v34, %v1205_v11 }
 0x20c   :  { %v991_v12 = vadd.f32 %v1207_v61, %v2390_v24  ;;  %v1208_v44 = vpop.f32.mrb[38].mxu0 }
 0x20d   :  { %v1209_v14 = vpop.f32.mrb[39].mxu0 }
 0x20e   :  { %1061 = vst [vmem:[%s2467_s8 + $0x10] sm:$0xff] %v991_v12  ;;  %v1210_v18 = vadd.f32 %v1209_v14, %v1208_v44 }
 0x210   :  { %v996_v19 = vadd.f32 %v1210_v18, %v2390_v24  ;;  %v1211_v20 = vpop.f32.mrb[40].mxu0 }
 0x211   :  { %v1212_v59 = vpop.f32.mrb[41].mxu0 }
 0x212   :  { %1062 = vst [vmem:[%s2467_s8 + $0x18] sm:$0xff] %v996_v19  ;;  %v1213_v56 = vadd.f32 %v1212_v59, %v1211_v20 }
 0x214   :  { %v1001_v22 = vadd.f32 %v1213_v56, %v2390_v24  ;;  %v1214_v23 = vpop.f32.mrb[42].mxu0 }
 0x215   :  { %v1215_v13 = vpop.f32.mrb[43].mxu0 }
 0x216   :  { %1063 = vst [vmem:[%s2467_s8 + $0x20] sm:$0xff] %v1001_v22  ;;  %v1216_v6 = vadd.f32 %v1215_v13, %v1214_v23 }
 0x218   :  { %v1006_v21 = vadd.f32 %v1216_v6, %v2390_v24  ;;  %v1217_v27 = vpop.f32.mrb[44].mxu0 }
 0x219   :  { %v1218_v15 = vpop.f32.mrb[45].mxu0 }
 0x21a   :  { %1064 = vst [vmem:[%s2467_s8 + $0x28] sm:$0xff] %v1006_v21  ;;  %v1219_v60 = vadd.f32 %v1218_v15, %v1217_v27 }
 0x21c   :  { %v1011_v7 = vadd.f32 %v1219_v60, %v2390_v24  ;;  %v1220_v42 = vpop.f32.mrb[46].mxu0 }
 0x21d   :  { %v1221_v16 = vpop.f32.mrb[47].mxu0 }
 0x21e   :  { %1065 = vst [vmem:[%s2467_s8 + $0x30] sm:$0xff] %v1011_v7  ;;  %v1222_v26 = vadd.f32 %v1221_v16, %v1220_v42 }
 0x220   :  { %v1016_v40 = vadd.f32 %v1222_v26, %v2390_v24  ;;  %v1223_v28 = vpop.f32.mrb[48].mxu0 }
 0x221   :  { %v1224_v29 = vpop.f32.mrb[49].mxu0 }
 0x222   :  { %1066 = vst [vmem:[%s2467_s8 + $0x38] sm:$0xff] %v1016_v40  ;;  %v1225_v30 = vadd.f32 %v1224_v29, %v1223_v28 }
 0x224   :  { %v1021_v43 = vadd.f32 %v1225_v30, %v2390_v24  ;;  %v1226_v45 = vpop.f32.mrb[50].mxu0 }
 0x225   :  { %v1227_v31 = vpop.f32.mrb[51].mxu0 }
 0x226   :  { %1067 = vst [vmem:[%s2467_s8 + $0x40] sm:$0xff] %v1021_v43  ;;  %v1228_v32 = vadd.f32 %v1227_v31, %v1226_v45 }
 0x228   :  { %v1026_v33 = vadd.f32 %v1228_v32, %v2390_v24  ;;  %v1229_v35 = vpop.f32.mrb[52].mxu0 }
 0x229   :  { %v1230_v36 = vpop.f32.mrb[53].mxu0 }
 0x22a   :  { %1068 = vst [vmem:[%s2467_s8 + $0x48] sm:$0xff] %v1026_v33  ;;  %v1231_v37 = vadd.f32 %v1230_v36, %v1229_v35 }
 0x22c   :  { %v1031_v38 = vadd.f32 %v1231_v37, %v2390_v24  ;;  %v1232_v46 = vpop.f32.mrb[54].mxu0 }
 0x22d   :  { %v1233_v48 = vpop.f32.mrb[55].mxu0 }
 0x22e   :  { %1069 = vst [vmem:[%s2467_s8 + $0x50] sm:$0xff] %v1031_v38  ;;  %v1234_v47 = vadd.f32 %v1233_v48, %v1232_v46 }
 0x230   :  { %v1036_v49 = vadd.f32 %v1234_v47, %v2390_v24  ;;  %v1235_v50 = vpop.f32.mrb[56].mxu0 }
 0x231   :  { %v1236_v51 = vpop.f32.mrb[57].mxu0 }
 0x232   :  { %1070 = vst [vmem:[%s2467_s8 + $0x58] sm:$0xff] %v1036_v49  ;;  %v1237_v55 = vadd.f32 %v1236_v51, %v1235_v50 }
 0x234   :  { %v1041_v52 = vadd.f32 %v1237_v55, %v2390_v24  ;;  %v1238_v53 = vpop.f32.mrb[58].mxu0 }
 0x235   :  { %v1239_v54 = vpop.f32.mrb[59].mxu0 }
 0x236   :  { %1071 = vst [vmem:[%s2467_s8 + $0x60] sm:$0xff] %v1041_v52  ;;  %v1240_v62 = vadd.f32 %v1239_v54, %v1238_v53 }
 0x238   :  { %v1046_v10 = vadd.f32 %v1240_v62, %v2390_v24  ;;  %v1241_v57 = vpop.f32.mrb[60].mxu0 }
 0x239   :  { %v1242_v58 = vpop.f32.mrb[61].mxu0 }
 0x23a   :  { %1072 = vst [vmem:[%s2467_s8 + $0x68] sm:$0xff] %v1046_v10  ;;  %v1243_v0 = vadd.f32 %v1242_v58, %v1241_v57 }
 0x23c   :  { %v1051_v1 = vadd.f32 %v1243_v0, %v2390_v24  ;;  %v1244_v17 = vpop.f32.mrb[62].mxu0 }
 0x23d   :  { %v1245_v2 = vpop.f32.mrb[63].mxu0 }
 0x23e   :  { %1073 = vst [vmem:[%s2467_s8 + $0x70] sm:$0xff] %v1051_v1  ;;  %v1246_v4 = vadd.f32 %v1245_v2, %v1244_v17 }
 0x240   :  { %v1056_v5 = vadd.f32 %v1246_v4, %v2390_v24 }
 0x242   :  { %1074 = vst [vmem:[%s2467_s8 + $0x78] sm:$0xff] %v1056_v5 }

// kernel: dual_gnn_forward.3
= control target key start
LH: loop header
LB: loop body
LE: loop exit
PB: predicated region body
PF: predicated region fallthrough
CT: control target
= control target key end

     0   :  { %s1612_s18 = smov 0   ;;  %s1614_s19 = smov 0   ;;  %s2446_s0 = inlined_call_operand.vmem [shape: f32[128,128], index: 0, kind: input, shape index: {}]   ;;  %s2447_s1 = inlined_call_operand.vmem [shape: f32[128,128], index: 1, kind: input, shape index: {}]   ;;  %s2448_s2 = inlined_call_operand.vmem [shape: f32[128,128], index: 2, kind: input, shape index: {}]   ;;  %s2449_s3 = inlined_call_operand.vmem [shape: f32[128,128], index: 3, kind: input, shape index: {}]   ;;  %s2450_s4 = inlined_call_operand.vmem [shape: f32[128,128], index: 4, kind: input, shape index: {}]   ;;  %s2451_s5 = inlined_call_operand.vmem [shape: f32[128,128], index: 5, kind: output, shape index: {}]  }
   0x1   :  { %s1616_s20 = smov 0  }
   0x2 LB: > { %s27_s21 = sadd.s32 1, %s1575_s19  ;;  %p1214_p0 = scmp.ge.s32.totalorder %s1579_s20, 1  ;;  %s1579_s20 = sphi %s1616_s20, %s15_s20   ;;  %s1575_s19 = sphi %s1614_s19, %s2453_s19   ;;  %s1571_s18 = sphi %s1612_s18, %s2452_s18  }
   0x3   : > { %p29_p1 = scmp.ge.s32.totalorder %s27_s21, 5  ;;  %p200_p2 = scmp.lt.s32.totalorder %s1579_s20, 6 }
   0x5   : > { %s2455_s21 = smov (%p29_p1, %s27_s21), 0  ;;  %p201_p3 = pnand %p1214_p0, %p200_p2 }
   0x6   : > { %p240_p4 = scmp.eq.s32.totalorder (!%p201_p3), %s1571_s18, 0 }
   0x7   : > { %204 = sbr.rel (%p201_p3) target bundleno = 683 (0x2ab), region = 40 }
   0xe   : > { %245 = sbr.rel (!%p240_p4) target bundleno = 31 (0x1f), region = 44  ;;  %v246_v0 = vld [vmem:[%s2448_s2] sm:$0xff] (%p240_p4)  ;;  %v247_v1 = vld [vmem:[%s2448_s2 + $0x8] sm:$0xff] (%p240_p4)  ;;  %v248_v2 = vld [vmem:[%s2448_s2 + $0x10] sm:$0xff] (%p240_p4) }
   0xf   : > { %262 = vst [vmem:[#allocation2] sm:$0xff] (%p240_p4), %v246_v0  ;;  %263 = vst [vmem:[#allocation2 + $0x8] sm:$0xff] (%p240_p4), %v247_v1  ;;  %v249_v3 = vld [vmem:[%s2448_s2 + $0x18] sm:$0xff] (%p240_p4)  ;;  %v250_v4 = vld [vmem:[%s2448_s2 + $0x20] sm:$0xff] (%p240_p4) }
  0x10   : > { %264 = vst [vmem:[#allocation2 + $0x10] sm:$0xff] (%p240_p4), %v248_v2  ;;  %v251_v5 = vld [vmem:[%s2448_s2 + $0x28] sm:$0xff] (%p240_p4)  ;;  %265 = vst [vmem:[#allocation2 + $0x18] sm:$0xff] (%p240_p4), %v249_v3  ;;  %v252_v6 = vld [vmem:[%s2448_s2 + $0x30] sm:$0xff] (%p240_p4) }
  0x11   : > { %266 = vst [vmem:[#allocation2 + $0x20] sm:$0xff] (%p240_p4), %v250_v4  ;;  %267 = vst [vmem:[#allocation2 + $0x28] sm:$0xff] (%p240_p4), %v251_v5  ;;  %v253_v7 = vld [vmem:[%s2448_s2 + $0x38] sm:$0xff] (%p240_p4)  ;;  %v254_v8 = vld [vmem:[%s2448_s2 + $0x40] sm:$0xff] (%p240_p4) }
  0x12   : > { %268 = vst [vmem:[#allocation2 + $0x30] sm:$0xff] (%p240_p4), %v252_v6  ;;  %269 = vst [vmem:[#allocation2 + $0x38] sm:$0xff] (%p240_p4), %v253_v7  ;;  %v255_v9 = vld [vmem:[%s2448_s2 + $0x48] sm:$0xff] (%p240_p4)  ;;  %v256_v10 = vld [vmem:[%s2448_s2 + $0x50] sm:$0xff] (%p240_p4) }
  0x13   : > { %270 = vst [vmem:[#allocation2 + $0x40] sm:$0xff] (%p240_p4), %v254_v8  ;;  %v257_v11 = vld [vmem:[%s2448_s2 + $0x58] sm:$0xff] (%p240_p4)  ;;  %271 = vst [vmem:[#allocation2 + $0x48] sm:$0xff] (%p240_p4), %v255_v9  ;;  %v258_v12 = vld [vmem:[%s2448_s2 + $0x60] sm:$0xff] (%p240_p4) }
  0x14   : > { %272 = vst [vmem:[#allocation2 + $0x50] sm:$0xff] (%p240_p4), %v256_v10  ;;  %273 = vst [vmem:[#allocation2 + $0x58] sm:$0xff] (%p240_p4), %v257_v11  ;;  %v259_v13 = vld [vmem:[%s2448_s2 + $0x68] sm:$0xff] (%p240_p4)  ;;  %v260_v14 = vld [vmem:[%s2448_s2 + $0x70] sm:$0xff] (%p240_p4) }
  0x15   : > { %274 = vst [vmem:[#allocation2 + $0x60] sm:$0xff] %v258_v12  ;;  %275 = vst [vmem:[#allocation2 + $0x68] sm:$0xff] %v259_v13  ;;  %v261_v15 = vld [vmem:[%s2448_s2 + $0x78] sm:$0xff]  ;;  %v278_v16 = vld [vmem:[%s2449_s3] sm:$0xff] }
  0x16   : > { %276 = vst [vmem:[#allocation2 + $0x70] sm:$0xff] %v260_v14  ;;  %v279_v17 = vld [vmem:[%s2449_s3 + $0x8] sm:$0xff]  ;;  %277 = vst [vmem:[#allocation2 + $0x78] sm:$0xff] %v261_v15  ;;  %v280_v18 = vld [vmem:[%s2449_s3 + $0x10] sm:$0xff] }
  0x17   : > { %294 = vst [vmem:[#allocation3] sm:$0xff] %v278_v16  ;;  %295 = vst [vmem:[#allocation3 + $0x8] sm:$0xff] %v279_v17  ;;  %v281_v19 = vld [vmem:[%s2449_s3 + $0x18] sm:$0xff]  ;;  %v282_v20 = vld [vmem:[%s2449_s3 + $0x20] sm:$0xff] }
  0x18   : > { %296 = vst [vmem:[#allocation3 + $0x10] sm:$0xff] %v280_v18  ;;  %297 = vst [vmem:[#allocation3 + $0x18] sm:$0xff] %v281_v19  ;;  %v283_v21 = vld [vmem:[%s2449_s3 + $0x28] sm:$0xff]  ;;  %v284_v22 = vld [vmem:[%s2449_s3 + $0x30] sm:$0xff] }
  0x19   : > { %298 = vst [vmem:[#allocation3 + $0x20] sm:$0xff] %v282_v20  ;;  %v285_v23 = vld [vmem:[%s2449_s3 + $0x38] sm:$0xff]  ;;  %299 = vst [vmem:[#allocation3 + $0x28] sm:$0xff] %v283_v21  ;;  %v286_v24 = vld [vmem:[%s2449_s3 + $0x40] sm:$0xff] }
  0x1a   : > { %300 = vst [vmem:[#allocation3 + $0x30] sm:$0xff] %v284_v22  ;;  %301 = vst [vmem:[#allocation3 + $0x38] sm:$0xff] %v285_v23  ;;  %v287_v25 = vld [vmem:[%s2449_s3 + $0x48] sm:$0xff]  ;;  %v288_v26 = vld [vmem:[%s2449_s3 + $0x50] sm:$0xff] }
  0x1b   : > { %302 = vst [vmem:[#allocation3 + $0x40] sm:$0xff] %v286_v24  ;;  %303 = vst [vmem:[#allocation3 + $0x48] sm:$0xff] %v287_v25  ;;  %v289_v27 = vld [vmem:[%s2449_s3 + $0x58] sm:$0xff]  ;;  %v290_v28 = vld [vmem:[%s2449_s3 + $0x60] sm:$0xff] }
  0x1c   : > { %304 = vst [vmem:[#allocation3 + $0x50] sm:$0xff] %v288_v26  ;;  %v291_v29 = vld [vmem:[%s2449_s3 + $0x68] sm:$0xff]  ;;  %305 = vst [vmem:[#allocation3 + $0x58] sm:$0xff] %v289_v27  ;;  %v292_v30 = vld [vmem:[%s2449_s3 + $0x70] sm:$0xff] }
  0x1d   : > { %306 = vst [vmem:[#allocation3 + $0x60] sm:$0xff] %v290_v28  ;;  %307 = vst [vmem:[#allocation3 + $0x68] sm:$0xff] %v291_v29  ;;  %v293_v31 = vld [vmem:[%s2449_s3 + $0x78] sm:$0xff] }
  0x1e   : > { %308 = vst [vmem:[#allocation3 + $0x70] sm:$0xff] %v292_v30  ;;  %309 = vst [vmem:[#allocation3 + $0x78] sm:$0xff] %v293_v31 }
  0x1f PF: > { %p310_p5 = scmp.lt.s32.totalorder %s1571_s18, 0  ;;  %s311_s23 = ssub.s32 0, %s1571_s18  ;;  %v324_v32 = vld [vmem:[%s2446_s0] sm:$0xff]  ;;  %v325_v18 = vld [vmem:[%s2446_s0 + $0x8] sm:$0xff]  ;;  %v326_v20 = vld [vmem:[%s2446_s0 + $0x10] sm:$0xff] }
  0x20   : > { %v340_v33 = vld [vmem:[%s2447_s1] sm:$0xff]  ;;  %s1216_s28 = smin.u32 %s1571_s18, %s311_s23  ;;  %1324 = vmatprep.mubr.f32.mxu0 %v324_v32  ;;  %v341_v19 = vld [vmem:[%s2447_s1 + $0x8] sm:$0xff]  ;;  %v342_v21 = vld [vmem:[%s2447_s1 + $0x10] sm:$0xff]  ;;  %p1220_p7 = scmp.ge.s32.totalorder %s1571_s18, 4 }
  0x21   : > { %1380 = vmatprep.mubr.f32.mxu1 %v340_v33  ;;  %s313_s29 = sand.u32 1, %s1216_s28   ;;  %v327_v22 = vld [vmem:[%s2446_s0 + $0x18] sm:$0xff]  ;;  %v328_v24 = vld [vmem:[%s2446_s0 + $0x20] sm:$0xff]  ;;  %v329_v26 = vld [vmem:[%s2446_s0 + $0x28] sm:$0xff] }
  0x22   : > { %s314_s30 = ssub.s32 0, %s313_s29  ;;  %v343_v23 = vld [vmem:[%s2447_s1 + $0x18] sm:$0xff]  ;;  %v344_v25 = vld [vmem:[%s2447_s1 + $0x20] sm:$0xff]  ;;  %v345_v27 = vld [vmem:[%s2447_s1 + $0x28] sm:$0xff] }
  0x23   : > { %s2457_s30 = smov (!%p310_p5, %s314_s30), %s313_s29  ;;  %v330_v28 = vld [vmem:[%s2446_s0 + $0x30] sm:$0xff]  ;;  %v331_v30 = vld [vmem:[%s2446_s0 + $0x38] sm:$0xff]  ;;  %v332_v32 = vld [vmem:[%s2446_s0 + $0x40] sm:$0xff] }
  0x24   : > { %p1218_p6 = scmp.lt.s32.totalorder %s2457_s30, 0  ;;  %s320_s6 = sadd.s32 2, %s2457_s30  ;;  %v346_v29 = vld [vmem:[%s2447_s1 + $0x30] sm:$0xff]  ;;  %v347_v31 = vld [vmem:[%s2447_s1 + $0x38] sm:$0xff]  ;;  %v348_v33 = vld [vmem:[%s2447_s1 + $0x40] sm:$0xff] }
  0x26   : > { %s2459_s6 = smov (!%p1218_p6, %s320_s6), %s2457_s30 }
  0x27   : > { %s1219_s7 = sshll.u32 %s2459_s6, 7  ;;  %s814_s14 = ssub.s32 (!%p1220_p7), 1, %s2459_s6 }
  0x28   : > { %s1741_s8 = scalar_lea.vmem [#allocation2], %s1219_s7  ;;  %s1745_s9 = scalar_lea.vmem [#allocation3], %s1219_s7 }
  0x29   : > { %v357_v34 = vld [vmem:[%s1741_s8] sm:$0xff]  ;;  %v358_v35 = vld [vmem:[%s1741_s8 + $0x8] sm:$0xff]  ;;  %v359_v39 = vld [vmem:[%s1741_s8 + $0x10] sm:$0xff]  ;;  %s2029_s15 = sshll.u32 (!%p1220_p7), %s814_s14, 7 }
  0x2a   : > { %v374_v36 = vld [vmem:[%s1745_s9] sm:$0xff]  ;;  %v1404_v37 = vpack.c.bf16 %v358_v35, %v357_v34  ;;  %v375_v38 = vld [vmem:[%s1745_s9 + $0x8] sm:$0xff]  ;;  %v360_v40 = vld [vmem:[%s1741_s8 + $0x18] sm:$0xff]  ;;  %s817_s7 = scalar_lea.vmem (!%p1220_p7), [#allocation2], %s2029_s15 }
  0x2b   : > { %v1436_v41 = vpack.c.bf16 %v375_v38, %v374_v36  ;;  %v1408_v42 = vpack.c.bf16 %v360_v40, %v359_v39  ;;  %v376_v43 = vld [vmem:[%s1745_s9 + $0x10] sm:$0xff]  ;;  %v377_v44 = vld [vmem:[%s1745_s9 + $0x18] sm:$0xff]  ;;  %v361_v45 = vld [vmem:[%s1741_s8 + $0x20] sm:$0xff] }
  0x2c   : > { %1405 = vmatprep.subr.bf16.mxu0 %v1404_v37  ;;  %v1440_v46 = vpack.c.bf16 %v377_v44, %v376_v43  ;;  %v362_v47 = vld [vmem:[%s1741_s8 + $0x28] sm:$0xff]  ;;  %v378_v48 = vld [vmem:[%s1745_s9 + $0x20] sm:$0xff]  ;;  %v363_v52 = vld [vmem:[%s1741_s8 + $0x30] sm:$0xff] }
  0x2d   : > { %v379_v49 = vld [vmem:[%s1745_s9 + $0x28] sm:$0xff]  ;;  %1437 = vmatprep.subr.bf16.mxu1 %v1436_v41  ;;  %1407 = vmatpush3.bf16.msra.mxu0 %v1404_v37  ;;  %v1412_v50 = vpack.c.bf16 %v362_v47, %v361_v45  ;;  %v364_v53 = vld [vmem:[%s1741_s8 + $0x38] sm:$0xff]  ;;  %v380_v54 = vld [vmem:[%s1745_s9 + $0x30] sm:$0xff] }
  0x2e   : > { %1439 = vmatpush3.bf16.msra.mxu1 %v1436_v41  ;;  %1409 = vmatprep.subr.bf16.mxu0 %v1408_v42  ;;  %v1444_v51 = vpack.c.bf16 %v379_v49, %v378_v48  ;;  %v381_v55 = vld [vmem:[%s1745_s9 + $0x38] sm:$0xff]  ;;  %v1416_v56 = vpack.c.bf16 %v364_v53, %v363_v52  ;;  %v365_v58 = vld [vmem:[%s1741_s8 + $0x40] sm:$0xff]  ;;  %v366_v59 = vld [vmem:[%s1741_s8 + $0x48] sm:$0xff] }
  0x2f   : > { %1441 = vmatprep.subr.bf16.mxu1 %v1440_v46  ;;  %v1448_v57 = vpack.c.bf16 %v381_v55, %v380_v54  ;;  %v382_v60 = vld [vmem:[%s1745_s9 + $0x40] sm:$0xff]  ;;  %v383_v61 = vld [vmem:[%s1745_s9 + $0x48] sm:$0xff]  ;;  %v1420_v62 = vpack.c.bf16 %v366_v59, %v365_v58  ;;  %v367_v0 = vld [vmem:[%s1741_s8 + $0x50] sm:$0xff] }
  0x30   : > { %v1452_v63 = vpack.c.bf16 %v383_v61, %v382_v60  ;;  %v368_v1 = vld [vmem:[%s1741_s8 + $0x58] sm:$0xff]  ;;  %v384_v2 = vld [vmem:[%s1745_s9 + $0x50] sm:$0xff]  ;;  %v369_v6 = vld [vmem:[%s1741_s8 + $0x60] sm:$0xff] }
  0x31   : > { %1411 = vmatpush3.bf16.msra.mxu0 %v1408_v42  ;;  %v385_v3 = vld [vmem:[%s1745_s9 + $0x58] sm:$0xff]  ;;  %v1424_v4 = vpack.c.bf16 %v368_v1, %v367_v0  ;;  %v370_v7 = vld [vmem:[%s1741_s8 + $0x68] sm:$0xff]  ;;  %v386_v8 = vld [vmem:[%s1745_s9 + $0x60] sm:$0xff] }
  0x32   : > { %1443 = vmatpush3.bf16.msra.mxu1 %v1440_v46  ;;  %1413 = vmatprep.subr.bf16.mxu0 %v1412_v50  ;;  %v1456_v5 = vpack.c.bf16 %v385_v3, %v384_v2  ;;  %v387_v9 = vld [vmem:[%s1745_s9 + $0x68] sm:$0xff]  ;;  %v1428_v10 = vpack.c.bf16 %v370_v7, %v369_v6  ;;  %v371_v12 = vld [vmem:[%s1741_s8 + $0x70] sm:$0xff]  ;;  %v372_v13 = vld [vmem:[%s1741_s8 + $0x78] sm:$0xff]  ;;  %s834_s8 = scalar_lea.vmem (!%p1220_p7), [#allocation3], %s2029_s15 }
  0x33   : > { %1445 = vmatprep.subr.bf16.mxu1 %v1444_v51  ;;  %v1460_v11 = vpack.c.bf16 %v387_v9, %v386_v8  ;;  %v388_v14 = vld [vmem:[%s1745_s9 + $0x70] sm:$0xff]  ;;  %v389_v15 = vld [vmem:[%s1745_s9 + $0x78] sm:$0xff]  ;;  %v1432_v16 = vpack.c.bf16 %v372_v13, %v371_v12  ;;  %v333_v34 = vld [vmem:[%s2446_s0 + $0x48] sm:$0xff] }
  0x34   : > { %v1464_v17 = vpack.c.bf16 %v389_v15, %v388_v14  ;;  %v349_v35 = vld [vmem:[%s2447_s1 + $0x48] sm:$0xff]  ;;  %v334_v36 = vld [vmem:[%s2446_s0 + $0x50] sm:$0xff]  ;;  %v335_v38 = vld [vmem:[%s2446_s0 + $0x58] sm:$0xff] }
  0x35   : > { %1415 = vmatpush3.bf16.msra.mxu0 %v1412_v50  ;;  %v350_v37 = vld [vmem:[%s2447_s1 + $0x50] sm:$0xff]  ;;  %v351_v39 = vld [vmem:[%s2447_s1 + $0x58] sm:$0xff]  ;;  %v336_v40 = vld [vmem:[%s2446_s0 + $0x60] sm:$0xff] }
  0x36   : > { %1447 = vmatpush3.bf16.msra.mxu1 %v1444_v51  ;;  %1417 = vmatprep.subr.bf16.mxu0 %v1416_v56  ;;  %v352_v41 = vld [vmem:[%s2447_s1 + $0x60] sm:$0xff]  ;;  %v337_v42 = vld [vmem:[%s2446_s0 + $0x68] sm:$0xff]  ;;  %v338_v44 = vld [vmem:[%s2446_s0 + $0x70] sm:$0xff] }
  0x37   : > { %1449 = vmatprep.subr.bf16.mxu1 %v1448_v57  ;;  %v353_v43 = vld [vmem:[%s2447_s1 + $0x68] sm:$0xff]  ;;  %v354_v45 = vld [vmem:[%s2447_s1 + $0x70] sm:$0xff]  ;;  %v339_v46 = vld [vmem:[%s2446_s0 + $0x78] sm:$0xff] }
  0x38   : > { %v355_v47 = vld [vmem:[%s2447_s1 + $0x78] sm:$0xff]  ;;  %v553_v48 = vld [vmem:[%s2448_s2 + $0x8] sm:$0xff]  ;;  %v552_v50 = vld [vmem:[%s2448_s2] sm:$0xff] }
  0x39   : > { %1419 = vmatpush3.bf16.msra.mxu0 %v1416_v56  ;;  %v763_v49 = vld [vmem:[%s2449_s3 + $0x8] sm:$0xff]  ;;  %v762_v51 = vld [vmem:[%s2449_s3] sm:$0xff]  ;;  %v555_v52 = vld [vmem:[%s2448_s2 + $0x18] sm:$0xff]  ;;  %v569_v56 = vmul.f32 0.1, %v553_v48 }
  0x3a   : > { %1451 = vmatpush3.bf16.msra.mxu1 %v1448_v57  ;;  %1421 = vmatprep.subr.bf16.mxu0 %v1420_v62  ;;  %v765_v53 = vld [vmem:[%s2449_s3 + $0x18] sm:$0xff]  ;;  %v554_v54 = vld [vmem:[%s2448_s2 + $0x10] sm:$0xff]  ;;  %v779_v57 = vmul.f32 0.1, %v763_v49  ;;  %v557_v58 = vld [vmem:[%s2448_s2 + $0x28] sm:$0xff] }
  0x3b   : > { %1453 = vmatprep.subr.bf16.mxu1 %v1452_v63  ;;  %v764_v55 = vld [vmem:[%s2449_s3 + $0x10] sm:$0xff]  ;;  %v568_v59 = vmul.f32 0.1, %v552_v50  ;;  %v778_v60 = vmul.f32 0.1, %v762_v51  ;;  %v767_v3 = vld [vmem:[%s2449_s3 + $0x28] sm:$0xff] }
  0x3c   : > { %v571_v61 = vmul.f32 0.1, %v555_v52  ;;  %v780_v0 = vmul.f32 0.1, %v764_v55  ;;  %v573_v2 = vmul.f32 0.1, %v557_v58 }
  0x3d   : > { %1423 = vmatpush3.bf16.msra.mxu0 %v1420_v62  ;;  %v781_v62 = vmul.f32 0.1, %v765_v53  ;;  %v766_v8 = vld [vmem:[%s2449_s3 + $0x20] sm:$0xff]  ;;  %v783_v14 = vmul.f32 0.1, %v767_v3 }
  0x3e   : > { %1455 = vmatpush3.bf16.msra.mxu1 %v1452_v63  ;;  %1425 = vmatprep.subr.bf16.mxu0 %v1424_v4  ;;  %v570_v63 = vmul.f32 0.1, %v554_v54 }
  0x3f   : > { %1457 = vmatprep.subr.bf16.mxu1 %v1456_v5 }
  0x41   : > { %1427 = vmatpush3.bf16.msra.mxu0 %v1424_v4  ;;  %v556_v4 = vld [vmem:[%s2448_s2 + $0x20] sm:$0xff] }
  0x42   : > { %1459 = vmatpush3.bf16.msra.mxu1 %v1456_v5  ;;  %1429 = vmatprep.subr.bf16.mxu0 %v1428_v10  ;;  %v572_v15 = vmul.f32 0.1, %v556_v4 }
  0x43   : > { %1461 = vmatprep.subr.bf16.mxu1 %v1460_v11 }
  0x45   : > { %1431 = vmatpush3.bf16.msra.mxu0 %v1428_v10 }
  0x46   : > { %1463 = vmatpush3.bf16.msra.mxu1 %v1460_v11  ;;  %1433 = vmatprep.subr.bf16.mxu0 %v1432_v16 }
  0x47   : > { %1465 = vmatprep.subr.bf16.mxu1 %v1464_v17 }
  0x49   : > { %1435 = vmatpush3.bf16.msra.mxu0 %v1432_v16 }
  0x4a   : > { %1467 = vmatpush3.bf16.msra.mxu1 %v1464_v17 }
  0x4c   : > { %1325 = vmatmul.mubr.f32.vlgmr.msra.gmra.mrb[0].mxu0 %v325_v18 }
  0x4d   : > { %1381 = vmatmul.mubr.f32.vlgmr.msra.gmra.mrb[0].mxu1 %v341_v19  ;;  %1327 = vmatprep.mubr.f32.mxu0 %v326_v20  ;;  %v782_v19 = vmul.f32 0.1, %v766_v8  ;;  %v559_v20 = vld [vmem:[%s2448_s2 + $0x38] sm:$0xff] }
  0x4e   : > { %1383 = vmatprep.mubr.f32.mxu1 %v342_v21  ;;  %v769_v21 = vld [vmem:[%s2449_s3 + $0x38] sm:$0xff] }
  0x50   : > { %1328 = vmatmul.mubr.f32.gmra.mrb[2].mxu0 %v327_v22 }
  0x51   : > { %1384 = vmatmul.mubr.f32.gmra.mrb[2].mxu1 %v343_v23  ;;  %1330 = vmatprep.mubr.f32.mxu0 %v328_v24 }
  0x52   : > { %1386 = vmatprep.mubr.f32.mxu1 %v344_v25 }
  0x54   : > { %1331 = vmatmul.mubr.f32.gmra.mrb[4].mxu0 %v329_v26  ;;  %v558_v26 = vld [vmem:[%s2448_s2 + $0x30] sm:$0xff] }
  0x55   : > { %1387 = vmatmul.mubr.f32.gmra.mrb[4].mxu1 %v345_v27  ;;  %1333 = vmatprep.mubr.f32.mxu0 %v330_v28 }
  0x56   : > { %1389 = vmatprep.mubr.f32.mxu1 %v346_v29 }
  0x58   : > { %1334 = vmatmul.mubr.f32.gmra.mrb[6].mxu0 %v331_v30 }
  0x59   : > { %1390 = vmatmul.mubr.f32.gmra.mrb[6].mxu1 %v347_v31  ;;  %1336 = vmatprep.mubr.f32.mxu0 %v332_v32  ;;  %v575_v32 = vmul.f32 0.1, %v559_v20 }
  0x5a   : > { %1392 = vmatprep.mubr.f32.mxu1 %v348_v33  ;;  %v785_v33 = vmul.f32 0.1, %v769_v21 }
  0x5c   : > { %1337 = vmatmul.mubr.f32.gmra.mrb[8].mxu0 %v333_v34 }
  0x5d   : > { %1393 = vmatmul.mubr.f32.gmra.mrb[8].mxu1 %v349_v35  ;;  %1339 = vmatprep.mubr.f32.mxu0 %v334_v36 }
  0x5e   : > { %1395 = vmatprep.mubr.f32.mxu1 %v350_v37  ;;  %v574_v37 = vmul.f32 0.1, %v558_v26 }
  0x60   : > { %1340 = vmatmul.mubr.f32.gmra.mrb[10].mxu0 %v335_v38  ;;  %v768_v38 = vld [vmem:[%s2449_s3 + $0x30] sm:$0xff] }
  0x61   : > { %1396 = vmatmul.mubr.f32.gmra.mrb[10].mxu1 %v351_v39  ;;  %1342 = vmatprep.mubr.f32.mxu0 %v336_v40  ;;  %v561_v39 = vld [vmem:[%s2448_s2 + $0x48] sm:$0xff]  ;;  %v784_v50 = vmul.f32 0.1, %v768_v38 }
  0x62   : > { %1398 = vmatprep.mubr.f32.mxu1 %v352_v41  ;;  %v577_v51 = vmul.f32 0.1, %v561_v39 }
  0x64   : > { %1343 = vmatmul.mubr.f32.gmra.mrb[12].mxu0 %v337_v42 }
  0x65   : > { %1399 = vmatmul.mubr.f32.gmra.mrb[12].mxu1 %v353_v43  ;;  %1345 = vmatprep.mubr.f32.mxu0 %v338_v44  ;;  %v771_v44 = vld [vmem:[%s2449_s3 + $0x48] sm:$0xff] }
  0x66   : > { %1401 = vmatprep.mubr.f32.mxu1 %v354_v45  ;;  %v787_v55 = vmul.f32 0.1, %v771_v44 }
  0x68   : > { %1346 = vmatmul.mubr.f32.gmra.mrb[14].mxu0 %v339_v46 }
  0x69   : > { %1402 = vmatmul.mubr.f32.gmra.mrb[14].mxu1 %v355_v47 }
 0x11f   : > { %v1326_v1 = vpop.f32.mrb[0].mxu0 }
 0x120   : > { %v536_v5 = vmul.f32 0.9, %v1326_v1  ;;  %v1382_v6 = vpop.f32.mrb[0].mxu1  ;;  %v456_v7 = vpop.f32.mrb[1].mxu0 }
 0x121   : > { %v746_v9 = vmul.f32 0.9, %v1382_v6  ;;  %v535_v10 = vmul.f32 0.9, %v456_v7  ;;  %v666_v11 = vpop.f32.mrb[1].mxu1 }
 0x122   : > { %v1903_v12 = vadd.f32 %v569_v56, %v536_v5  ;;  %v745_v13 = vmul.f32 0.9, %v666_v11  ;;  %v560_v56 = vld [vmem:[%s2448_s2 + $0x40] sm:$0xff]  ;;  %v562_v11 = vld [vmem:[%s2448_s2 + $0x50] sm:$0xff] }
 0x123   : > { %v1905_v16 = vadd.f32 %v779_v57, %v746_v9  ;;  %v1907_v17 = vadd.f32 %v568_v59, %v535_v10  ;;  %v1329_v18 = vpop.f32.mrb[2].mxu0  ;;  %v770_v57 = vld [vmem:[%s2449_s3 + $0x40] sm:$0xff]  ;;  %v576_v4 = vmul.f32 0.1, %v560_v56  ;;  %v773_v10 = vld [vmem:[%s2449_s3 + $0x58] sm:$0xff] }
 0x124   : > { %v1915_v22 = vadd.f32 %v778_v60, %v745_v13  ;;  %v538_v23 = vmul.f32 0.9, %v1329_v18  ;;  %v1385_v24 = vpop.f32.mrb[2].mxu1  ;;  %v466_v25 = vpop.f32.mrb[3].mxu0  ;;  %v786_v5 = vmul.f32 0.1, %v770_v57 }
 0x125   : > { %v748_v27 = vmul.f32 0.9, %v1385_v24  ;;  %v537_v28 = vmul.f32 0.9, %v466_v25  ;;  %v676_v29 = vpop.f32.mrb[3].mxu1  ;;  %818 = vst [vmem:[%s817_s7] sm:$0xff] (!%p1220_p7), %v1907_v17  ;;  %819 = vst [vmem:[%s817_s7 + $0x8] sm:$0xff] (!%p1220_p7), %v1903_v12 }
 0x126   : > { %v1920_v30 = vadd.f32 %v571_v61, %v538_v23  ;;  %v747_v31 = vmul.f32 0.9, %v676_v29  ;;  %v789_v26 = vmul.f32 0.1, %v773_v10  ;;  %835 = vst [vmem:[%s834_s8] sm:$0xff] (!%p1220_p7), %v1915_v22  ;;  %836 = vst [vmem:[%s834_s8 + $0x8] sm:$0xff] (!%p1220_p7), %v1905_v16 }
 0x127   : > { %v1922_v34 = vadd.f32 %v781_v62, %v748_v27  ;;  %v1924_v35 = vadd.f32 %v570_v63, %v537_v28  ;;  %v1332_v36 = vpop.f32.mrb[4].mxu0  ;;  %v563_v62 = vld [vmem:[%s2448_s2 + $0x58] sm:$0xff]  ;;  %v578_v27 = vmul.f32 0.1, %v562_v11 }
 0x128   : > { %v1932_v40 = vadd.f32 %v780_v0, %v747_v31  ;;  %v540_v41 = vmul.f32 0.9, %v1332_v36  ;;  %v1388_v42 = vpop.f32.mrb[4].mxu1  ;;  %v476_v43 = vpop.f32.mrb[5].mxu0  ;;  %v579_v9 = vmul.f32 0.1, %v563_v62 }
 0x129   : > { %v750_v45 = vmul.f32 0.9, %v1388_v42  ;;  %v539_v46 = vmul.f32 0.9, %v476_v43  ;;  %v686_v47 = vpop.f32.mrb[5].mxu1  ;;  %v775_v36 = vld [vmem:[%s2449_s3 + $0x68] sm:$0xff] }
 0x12a   : > { %v1937_v48 = vadd.f32 %v573_v2, %v540_v41  ;;  %v749_v49 = vmul.f32 0.9, %v686_v47  ;;  %v564_v42 = vld [vmem:[%s2448_s2 + $0x60] sm:$0xff]  ;;  %820 = vst [vmem:[%s817_s7 + $0x10] sm:$0xff] (!%p1220_p7), %v1924_v35  ;;  %821 = vst [vmem:[%s817_s7 + $0x18] sm:$0xff] (!%p1220_p7), %v1920_v30 }
 0x12b   : > { %v1939_v52 = vadd.f32 %v783_v14, %v750_v45  ;;  %v1941_v53 = vadd.f32 %v572_v15, %v539_v46  ;;  %v1335_v54 = vpop.f32.mrb[6].mxu0  ;;  %v774_v43 = vld [vmem:[%s2449_s3 + $0x60] sm:$0xff]  ;;  %v580_v57 = vmul.f32 0.1, %v564_v42  ;;  %837 = vst [vmem:[%s834_s8 + $0x10] sm:$0xff] (!%p1220_p7), %v1932_v40  ;;  %838 = vst [vmem:[%s834_s8 + $0x18] sm:$0xff] (!%p1220_p7), %v1922_v34 }
 0x12c   : > { %v1949_v58 = vadd.f32 %v782_v19, %v749_v49  ;;  %v542_v59 = vmul.f32 0.9, %v1335_v54  ;;  %v1391_v60 = vpop.f32.mrb[6].mxu1  ;;  %v486_v61 = vpop.f32.mrb[7].mxu0  ;;  %v772_v19 = vld [vmem:[%s2449_s3 + $0x50] sm:$0xff]  ;;  %823 = vst [vmem:[%s817_s7 + $0x28] sm:$0xff] (!%p1220_p7), %v1937_v48 }
 0x12d   : > { %v752_v63 = vmul.f32 0.9, %v1391_v60  ;;  %v541_v0 = vmul.f32 0.9, %v486_v61  ;;  %v696_v1 = vpop.f32.mrb[7].mxu1  ;;  %v567_v60 = vld [vmem:[%s2448_s2 + $0x78] sm:$0xff] }
 0x12e   : > { %v1954_v2 = vadd.f32 %v575_v32, %v542_v59  ;;  %v751_v3 = vmul.f32 0.9, %v696_v1  ;;  %v788_v32 = vmul.f32 0.1, %v772_v19  ;;  %v790_v59 = vmul.f32 0.1, %v774_v43 }
 0x12f   : > { %v1956_v6 = vadd.f32 %v785_v33, %v752_v63  ;;  %v1958_v7 = vadd.f32 %v574_v37, %v541_v0  ;;  %v1338_v8 = vpop.f32.mrb[8].mxu0  ;;  %v565_v33 = vld [vmem:[%s2448_s2 + $0x68] sm:$0xff]  ;;  %v777_v1 = vld [vmem:[%s2449_s3 + $0x78] sm:$0xff]  ;;  %822 = vst [vmem:[%s817_s7 + $0x20] sm:$0xff] (!%p1220_p7), %v1941_v53  ;;  %839 = vst [vmem:[%s834_s8 + $0x20] sm:$0xff] (!%p1220_p7), %v1949_v58 }
 0x130   : > { %v1966_v13 = vadd.f32 %v784_v50, %v751_v3  ;;  %v544_v14 = vmul.f32 0.9, %v1338_v8  ;;  %v1394_v15 = vpop.f32.mrb[8].mxu1  ;;  %v496_v18 = vpop.f32.mrb[9].mxu0  ;;  %v581_v50 = vmul.f32 0.1, %v565_v33 }
 0x131   : > { %v754_v20 = vmul.f32 0.9, %v1394_v15  ;;  %v543_v21 = vmul.f32 0.9, %v496_v18  ;;  %v706_v23 = vpop.f32.mrb[9].mxu1  ;;  %v566_v3 = vld [vmem:[%s2448_s2 + $0x70] sm:$0xff] }
 0x132   : > { %v1971_v24 = vadd.f32 %v577_v51, %v544_v14  ;;  %v753_v25 = vmul.f32 0.9, %v706_v23  ;;  %v791_v51 = vmul.f32 0.1, %v775_v36  ;;  %v583_v14 = vmul.f32 0.1, %v567_v60 }
 0x133   : > { %v1973_v28 = vadd.f32 %v787_v55, %v754_v20  ;;  %v1975_v29 = vadd.f32 %v576_v4, %v543_v21  ;;  %v1341_v31 = vpop.f32.mrb[10].mxu0  ;;  %v793_v20 = vmul.f32 0.1, %v777_v1  ;;  %v582_v21 = vmul.f32 0.1, %v566_v3  ;;  %824 = vst [vmem:[%s817_s7 + $0x30] sm:$0xff] (!%p1220_p7), %v1958_v7 }
 0x134   : > { %v1983_v37 = vadd.f32 %v786_v5, %v753_v25  ;;  %v546_v38 = vmul.f32 0.9, %v1341_v31  ;;  %v1397_v39 = vpop.f32.mrb[10].mxu1  ;;  %v506_v41 = vpop.f32.mrb[11].mxu0  ;;  %825 = vst [vmem:[%s817_s7 + $0x38] sm:$0xff] (!%p1220_p7), %v1954_v2  ;;  %827 = vst [vmem:[%s817_s7 + $0x48] sm:$0xff] (!%p1220_p7), %v1971_v24 }
 0x135   : > { %v756_v44 = vmul.f32 0.9, %v1397_v39  ;;  %v545_v45 = vmul.f32 0.9, %v506_v41  ;;  %v716_v46 = vpop.f32.mrb[11].mxu1  ;;  %826 = vst [vmem:[%s817_s7 + $0x40] sm:$0xff] (!%p1220_p7), %v1975_v29 }
 0x136   : > { %v1991_v47 = vadd.f32 %v579_v9, %v546_v38  ;;  %v755_v49 = vmul.f32 0.9, %v716_v46  ;;  %v776_v9 = vld [vmem:[%s2449_s3 + $0x70] sm:$0xff]  ;;  %840 = vst [vmem:[%s834_s8 + $0x28] sm:$0xff] (!%p1220_p7), %v1939_v52  ;;  %841 = vst [vmem:[%s834_s8 + $0x30] sm:$0xff] (!%p1220_p7), %v1966_v13 }
 0x137   : > { %v1993_v54 = vadd.f32 %v789_v26, %v756_v44  ;;  %v1995_v55 = vadd.f32 %v578_v27, %v545_v45  ;;  %v1344_v56 = vpop.f32.mrb[12].mxu0  ;;  %v792_v31 = vmul.f32 0.1, %v776_v9  ;;  %v1581_v44 = vmov (!%p1220_p7), 0.0   ;;  %842 = vst [vmem:[%s834_s8 + $0x38] sm:$0xff] (!%p1220_p7), %v1956_v6  ;;  %843 = vst [vmem:[%s834_s8 + $0x40] sm:$0xff] (!%p1220_p7), %v1983_v37 }
 0x138   : > { %v2000_v61 = vadd.f32 %v788_v32, %v755_v49  ;;  %v548_v62 = vmul.f32 0.9, %v1344_v56  ;;  %v1400_v63 = vpop.f32.mrb[12].mxu1  ;;  %v516_v0 = vpop.f32.mrb[13].mxu0  ;;  %851 = vst [vmem:[%s2451_s5] sm:$0xff] (!%p1220_p7), %v1581_v44  ;;  %852 = vst [vmem:[%s2451_s5 + $0x8] sm:$0xff] (!%p1220_p7), %v1581_v44 }
 0x139   : > { %v758_v4 = vmul.f32 0.9, %v1400_v63  ;;  %v547_v5 = vmul.f32 0.9, %v516_v0  ;;  %v726_v8 = vpop.f32.mrb[13].mxu1  ;;  %853 = vst [vmem:[%s2451_s5 + $0x10] sm:$0xff] (!%p1220_p7), %v1581_v44 }
 0x13a   : > { %v2011_v10 = vadd.f32 %v581_v50, %v548_v62  ;;  %v757_v11 = vmul.f32 0.9, %v726_v8  ;;  %813 = sbr.rel (%p1220_p7) target bundleno = 328 (0x148), region = 48  ;;  %854 = vst [vmem:[%s2451_s5 + $0x18] sm:$0xff] (!%p1220_p7), %v1581_v44  ;;  %855 = vst [vmem:[%s2451_s5 + $0x20] sm:$0xff] (!%p1220_p7), %v1581_v44 }
 0x13b   : > { %v2013_v15 = vadd.f32 %v791_v51, %v758_v4  ;;  %v2015_v18 = vadd.f32 %v580_v57, %v547_v5  ;;  %v1347_v19 = vpop.f32.mrb[14].mxu0  ;;  %856 = vst [vmem:[%s2451_s5 + $0x28] sm:$0xff] (!%p1220_p7), %v1581_v44  ;;  %857 = vst [vmem:[%s2451_s5 + $0x30] sm:$0xff] (!%p1220_p7), %v1581_v44 }
 0x13c   : > { %v2017_v23 = vadd.f32 %v790_v59, %v757_v11  ;;  %v550_v25 = vmul.f32 0.9, %v1347_v19  ;;  %v1403_v26 = vpop.f32.mrb[14].mxu1  ;;  %v526_v27 = vpop.f32.mrb[15].mxu0  ;;  %858 = vst [vmem:[%s2451_s5 + $0x38] sm:$0xff] (!%p1220_p7), %v1581_v44  ;;  %859 = vst [vmem:[%s2451_s5 + $0x40] sm:$0xff] (!%p1220_p7), %v1581_v44 }
 0x13d   : > { %v760_v32 = vmul.f32 0.9, %v1403_v26  ;;  %v549_v33 = vmul.f32 0.9, %v526_v27  ;;  %v736_v36 = vpop.f32.mrb[15].mxu1  ;;  %860 = vst [vmem:[%s2451_s5 + $0x48] sm:$0xff] (!%p1220_p7), %v1581_v44 }
 0x13e   : > { %v2019_v38 = vadd.f32 %v583_v14, %v550_v25  ;;  %v759_v39 = vmul.f32 0.9, %v736_v36  ;;  %861 = vst [vmem:[%s2451_s5 + $0x50] sm:$0xff] (!%p1220_p7), %v1581_v44  ;;  %862 = vst [vmem:[%s2451_s5 + $0x58] sm:$0xff] (!%p1220_p7), %v1581_v44 }
 0x13f   : > { %v2021_v41 = vadd.f32 %v793_v20, %v760_v32  ;;  %v2023_v42 = vadd.f32 %v582_v21, %v549_v33  ;;  %863 = vst [vmem:[%s2451_s5 + $0x60] sm:$0xff] (!%p1220_p7), %v1581_v44  ;;  %864 = vst [vmem:[%s2451_s5 + $0x68] sm:$0xff] (!%p1220_p7), %v1581_v44 }
 0x140   : > { %v2025_v43 = vadd.f32 %v792_v31, %v759_v39  ;;  %865 = vst [vmem:[%s2451_s5 + $0x70] sm:$0xff] (!%p1220_p7), %v1581_v44  ;;  %866 = vst [vmem:[%s2451_s5 + $0x78] sm:$0xff] (!%p1220_p7), %v1581_v44 }
 0x141   : > { %828 = vst [vmem:[%s817_s7 + $0x50] sm:$0xff] %v1995_v55  ;;  %829 = vst [vmem:[%s817_s7 + $0x58] sm:$0xff] %v1991_v47 }
 0x142   : > { %830 = vst [vmem:[%s817_s7 + $0x60] sm:$0xff] %v2015_v18  ;;  %831 = vst [vmem:[%s817_s7 + $0x68] sm:$0xff] %v2011_v10 }
 0x143   : > { %832 = vst [vmem:[%s817_s7 + $0x70] sm:$0xff] %v2023_v42  ;;  %833 = vst [vmem:[%s817_s7 + $0x78] sm:$0xff] %v2019_v38 }
 0x144   : > { %844 = vst [vmem:[%s834_s8 + $0x48] sm:$0xff] %v1973_v28  ;;  %845 = vst [vmem:[%s834_s8 + $0x50] sm:$0xff] %v2000_v61 }
 0x145   : > { %846 = vst [vmem:[%s834_s8 + $0x58] sm:$0xff] %v1993_v54  ;;  %847 = vst [vmem:[%s834_s8 + $0x60] sm:$0xff] %v2017_v23 }
 0x146   : > { %848 = vst [vmem:[%s834_s8 + $0x68] sm:$0xff] %v2013_v15  ;;  %849 = vst [vmem:[%s834_s8 + $0x70] sm:$0xff] %v2025_v43 }
 0x147   : > { %850 = vst [vmem:[%s834_s8 + $0x78] sm:$0xff] %v2021_v41 }
 0x148 PF: > { %p1222_p8 = scmp.ne.s32.totalorder %s1571_s18, 4 }
 0x149   : > { %v871_v45 = vsub.f32 (!%p1222_p8), %v1907_v17, %v1915_v22  ;;  %v887_v46 = vld [vmem:[%s2450_s4] sm:$0xff] (!%p1222_p8)  ;;  %v919_v49 = vlaneseq (!%p1222_p8)  ;;  %v873_v50 = vsub.f32 (!%p1222_p8), %v1924_v35, %v1932_v40  ;;  %v889_v51 = vld [vmem:[%s2450_s4 + $0x10] sm:$0xff] (!%p1222_p8)  ;;  %v872_v56 = vsub.f32 (!%p1222_p8), %v1903_v12, %v1905_v16  ;;  %v888_v57 = vld [vmem:[%s2450_s4 + $0x8] sm:$0xff] (!%p1222_p8) }
 0x14a   : > { %870 = sbr.rel (%p1222_p8) target bundleno = 683 (0x2ab), region = 52  ;;  %v874_v17 = vsub.f32 (!%p1222_p8), %v1920_v30, %v1922_v34  ;;  %v890_v22 = vld [vmem:[%s2450_s4 + $0x18] sm:$0xff] (!%p1222_p8)  ;;  %v875_v12 = vsub.f32 (!%p1222_p8), %v1941_v53, %v1949_v58  ;;  %v891_v30 = vld [vmem:[%s2450_s4 + $0x20] sm:$0xff] (!%p1222_p8)  ;;  %v876_v34 = vsub.f32 (!%p1222_p8), %v1937_v48, %v1939_v52  ;;  %v892_v62 = vld [vmem:[%s2450_s4 + $0x28] sm:$0xff] (!%p1222_p8)  ;;  %v877_v48 = vsub.f32 (!%p1222_p8), %v1958_v7, %v1966_v13 }
 0x14b   : > { %v2134_v59 = vadd.f32 (!%p1222_p8), %v887_v46, %v871_v45  ;;  %v2136_v35 = vand.u32 (!%p1222_p8), 127, %v919_v49  ;;  %v2138_v40 = vadd.f32 (!%p1222_p8), %v889_v51, %v873_v50  ;;  %v2142_v16 = vadd.f32 (!%p1222_p8), %v888_v57, %v872_v56  ;;  %v893_v3 = vld [vmem:[%s2450_s4 + $0x30] sm:$0xff] (!%p1222_p8)  ;;  %v894_v7 = vld [vmem:[%s2450_s4 + $0x38] sm:$0xff] (!%p1222_p8)  ;;  %v895_v11 = vld [vmem:[%s2450_s4 + $0x40] sm:$0xff] (!%p1222_p8) }
 0x14c   : > { %v2144_v60 = vadd.f32 (!%p1222_p8), %v890_v22, %v874_v17  ;;  %v2161_v63 = vadd.f32 (!%p1222_p8), %v891_v30, %v875_v12  ;;  %v2171_v1 = vadd.f32 (!%p1222_p8), %v892_v62, %v876_v34  ;;  %v878_v4 = vsub.f32 (!%p1222_p8), %v1954_v2, %v1956_v6  ;;  %v897_v20 = vld [vmem:[%s2450_s4 + $0x50] sm:$0xff] (!%p1222_p8)  ;;  %v898_v25 = vld [vmem:[%s2450_s4 + $0x58] sm:$0xff] (!%p1222_p8)  ;;  %v899_v31 = vld [vmem:[%s2450_s4 + $0x60] sm:$0xff] (!%p1222_p8) }
 0x14d   : > { %vm921_vm0 = vcmp.lt.s32.totalorder (!%p1222_p8), %v2136_v35, 8  ;;  %v2181_v13 = vadd.f32 (!%p1222_p8), %v893_v3, %v877_v48  ;;  %v879_v5 = vsub.f32 (!%p1222_p8), %v1975_v29, %v1983_v37  ;;  %v880_v6 = vsub.f32 (!%p1222_p8), %v1971_v24, %v1973_v28  ;;  %v896_v29 = vld [vmem:[%s2450_s4 + $0x48] sm:$0xff] (!%p1222_p8)  ;;  %v901_v39 = vld [vmem:[%s2450_s4 + $0x70] sm:$0xff] (!%p1222_p8)  ;;  %v902_v44 = vld [vmem:[%s2450_s4 + $0x78] sm:$0xff] (!%p1222_p8) }
 0x14e   : > { %v922_v53 = vsel (!%p1222_p8), %vm921_vm0, %v2134_v59, -1e+30  ;;  %v924_v58 = vsel (!%p1222_p8), %vm921_vm0, %v2138_v40, -1e+30  ;;  %v923_v52 = vsel (!%p1222_p8), %vm921_vm0, %v2142_v16, -1e+30  ;;  %v2191_v2 = vadd.f32 (!%p1222_p8), %v894_v7, %v878_v4 }
 0x14f   : > { %938 = vmax.xlane.f32.xlu0 (!%p1222_p8), %v922_v53  ;;  %942 = vmax.xlane.f32.xlu1 (!%p1222_p8), %v924_v58  ;;  %v925_v0 = vsel (!%p1222_p8), %vm921_vm0, %v2144_v60, -1e+30  ;;  %v926_v8 = vsel (!%p1222_p8), %vm921_vm0, %v2161_v63, -1e+30  ;;  %v927_v9 = vsel (!%p1222_p8), %vm921_vm0, %v2171_v1, -1e+30  ;;  %v881_v14 = vsub.f32 (!%p1222_p8), %v1995_v55, %v2000_v61 }
 0x150   : > { %v928_v37 = vsel (!%p1222_p8), %vm921_vm0, %v2181_v13, -1e+30  ;;  %v929_v24 = vsel (!%p1222_p8), %vm921_vm0, %v2191_v2, -1e+30  ;;  %v2209_v28 = vadd.f32 (!%p1222_p8), %v895_v11, %v879_v5  ;;  %v2211_v19 = vadd.f32 (!%p1222_p8), %v896_v29, %v880_v6 }
 0x151   : > { %v882_v21 = vsub.f32 %v1991_v47, %v1993_v54  ;;  %v2221_v55 = vadd.f32 %v897_v20, %v881_v14  ;;  %v883_v61 = vsub.f32 %v2015_v18, %v2017_v23  ;;  %v884_v54 = vsub.f32 %v2011_v10, %v2013_v15  ;;  %v900_v18 = vld [vmem:[%s2450_s4 + $0x68] sm:$0xff] }
 0x152   : > { %v930_v26 = vsel %vm921_vm0, %v2209_v28, -1e+30  ;;  %v931_v27 = vsel %vm921_vm0, %v2211_v19, -1e+30  ;;  %v885_v32 = vsub.f32 %v2023_v42, %v2025_v43  ;;  %v886_v36 = vsub.f32 %v2019_v38, %v2021_v41 }
 0x153   : > { %940 = vmax.xlane.f32.xlu0 %v923_v52  ;;  %944 = vmax.xlane.f32.xlu1 %v925_v0  ;;  %v2231_v47 = vadd.f32 %v898_v25, %v882_v21  ;;  %v932_v23 = vsel %vm921_vm0, %v2221_v55, -1e+30  ;;  %v2249_v15 = vadd.f32 %v899_v31, %v883_v61  ;;  %v2251_v33 = vadd.f32 %v900_v18, %v884_v54 }
 0x154   : > { %v2267_v45 = vadd.f32 %v901_v39, %v885_v32  ;;  %v2269_v38 = vadd.f32 %v902_v44, %v886_v36 }
 0x155   : > { %v933_v10 = vsel %vm921_vm0, %v2231_v47, -1e+30  ;;  %v934_v42 = vsel %vm921_vm0, %v2249_v15, -1e+30  ;;  %v935_v43 = vsel %vm921_vm0, %v2251_v33, -1e+30 }
 0x156   : > { %v936_v41 = vsel %vm921_vm0, %v2267_v45, -1e+30  ;;  %v937_v46 = vsel %vm921_vm0, %v2269_v38, -1e+30 }
 0x157   : > { %946 = vmax.xlane.f32.xlu0 %v926_v8  ;;  %948 = vmax.xlane.f32.xlu1 %v927_v9 }
 0x15b   : > { %950 = vmax.xlane.f32.xlu0 %v928_v37  ;;  %952 = vmax.xlane.f32.xlu1 %v929_v24 }
 0x15f   : > { %954 = vmax.xlane.f32.xlu0 %v930_v26  ;;  %956 = vmax.xlane.f32.xlu1 %v931_v27 }
 0x163   : > { %958 = vmax.xlane.f32.xlu0 %v932_v23  ;;  %960 = vmax.xlane.f32.xlu1 %v933_v10 }
 0x167   : > { %962 = vmax.xlane.f32.xlu0 %v934_v42  ;;  %964 = vmax.xlane.f32.xlu1 %v935_v43 }
 0x16b   : > { %966 = vmax.xlane.f32.xlu0 %v936_v41  ;;  %968 = vmax.xlane.f32.xlu1 %v937_v46 }
 0x1dc   : > { %v939_v49 = vpop.xlane.xlu0 %938  ;;  %v943_v50 = vpop.xlane.xlu1 %942 }
 0x1dd   : > { %v2278_v51 = vsub.f32 %v2134_v59, %v939_v49  ;;  %v2281_v56 = vsub.f32 %v2138_v40, %v943_v50 }
 0x1df   : > { %v986_v57 = vmul.f32 1.442695, %v2278_v51  ;;  %v990_v17 = vmul.f32 1.442695, %v2281_v56 }
 0x1e0   : > { %v941_v22 = vpop.xlane.xlu0 %940  ;;  %v945_v12 = vpop.xlane.xlu1 %944 }
 0x1e1   : > { %1493 = vpow2.f32 %v986_v57  ;;  %v2286_v30 = vsub.f32 %v2142_v16, %v941_v22  ;;  %v2289_v34 = vsub.f32 %v2144_v60, %v945_v12 }
 0x1e2   : > { %1495 = vpow2.f32 %v990_v17 }
 0x1e3   : > { %v988_v59 = vmul.f32 1.442695, %v2286_v30  ;;  %v992_v62 = vmul.f32 1.442695, %v2289_v34 }
 0x1e4   : > { %v947_v40 = vpop.xlane.xlu0 %946  ;;  %v949_v53 = vpop.xlane.xlu1 %948 }
 0x1e5   : > { %1497 = vpow2.f32 %v988_v59  ;;  %v2294_v58 = vsub.f32 %v2161_v63, %v947_v40  ;;  %v2297_v48 = vsub.f32 %v2171_v1, %v949_v53 }
 0x1e6   : > { %1499 = vpow2.f32 %v992_v62 }
 0x1e7   : > { %v994_v16 = vmul.f32 1.442695, %v2294_v58  ;;  %v996_v60 = vmul.f32 1.442695, %v2297_v48 }
 0x1e8   : > { %v951_v52 = vpop.xlane.xlu0 %950  ;;  %v953_v0 = vpop.xlane.xlu1 %952 }
 0x1e9   : > { %1501 = vpow2.f32 %v994_v16  ;;  %v2302_v3 = vsub.f32 %v2181_v13, %v951_v52  ;;  %v2305_v4 = vsub.f32 %v2191_v2, %v953_v0 }
 0x1ea   : > { %1503 = vpow2.f32 %v996_v60 }
 0x1eb   : > { %v1494_v63 = vpop.eup %1493  ;;  %v998_v7 = vmul.f32 1.442695, %v2302_v3  ;;  %v1000_v1 = vmul.f32 1.442695, %v2305_v4 }
 0x1ec   : > { %v1496_v5 = vpop.eup %1495  ;;  %v955_v8 = vpop.xlane.xlu0 %954  ;;  %v1018_v9 = vsel %vm921_vm0, %v1494_v63, 0.0 }
 0x1ed   : > { %v957_v6 = vpop.xlane.xlu1 %956  ;;  %1505 = vpow2.f32 %v998_v7  ;;  %v2312_v11 = vsub.f32 %v2209_v28, %v955_v8  ;;  %1034 = vadd.xlane.f32.xlu0 %v1018_v9  ;;  %v1020_v2 = vsel %vm921_vm0, %v1496_v5, 0.0 }
 0x1ee   : > { %v2315_v13 = vsub.f32 %v2211_v19, %v957_v6  ;;  %1507 = vpow2.f32 %v1000_v1 }
 0x1ef   : > { %v1498_v29 = vpop.eup %1497  ;;  %v1002_v37 = vmul.f32 1.442695, %v2312_v11 }
 0x1f0   : > { %v1004_v14 = vmul.f32 1.442695, %v2315_v13  ;;  %v1500_v24 = vpop.eup %1499  ;;  %v959_v20 = vpop.xlane.xlu0 %958  ;;  %v1019_v21 = vsel %vm921_vm0, %v1498_v29, 0.0 }
 0x1f1   : > { %v961_v28 = vpop.xlane.xlu1 %960  ;;  %1509 = vpow2.f32 %v1002_v37  ;;  %v2324_v25 = vsub.f32 %v2221_v55, %v959_v20  ;;  %1038 = vadd.xlane.f32.xlu0 %v1020_v2  ;;  %1036 = vadd.xlane.f32.xlu1 %v1019_v21  ;;  %v1021_v61 = vsel %vm921_vm0, %v1500_v24, 0.0 }
 0x1f2   : > { %v2327_v19 = vsub.f32 %v2231_v47, %v961_v28  ;;  %1511 = vpow2.f32 %v1004_v14 }
 0x1f3   : > { %v1502_v26 = vpop.eup %1501  ;;  %v1006_v27 = vmul.f32 1.442695, %v2324_v25 }
 0x1f4   : > { %v1008_v54 = vmul.f32 1.442695, %v2327_v19  ;;  %v1504_v31 = vpop.eup %1503  ;;  %v963_v18 = vpop.xlane.xlu0 %962  ;;  %v1022_v55 = vsel %vm921_vm0, %v1502_v26, 0.0 }
 0x1f5   : > { %v965_v23 = vpop.xlane.xlu1 %964  ;;  %1513 = vpow2.f32 %v1006_v27  ;;  %v2336_v32 = vsub.f32 %v2249_v15, %v963_v18  ;;  %1040 = vadd.xlane.f32.xlu1 %v1021_v61  ;;  %1042 = vadd.xlane.f32.xlu0 %v1022_v55  ;;  %v1023_v10 = vsel %vm921_vm0, %v1504_v31, 0.0 }
 0x1f6   : > { %v2339_v47 = vsub.f32 %v2251_v33, %v965_v23  ;;  %1515 = vpow2.f32 %v1008_v54 }
 0x1f7   : > { %v1506_v36 = vpop.eup %1505  ;;  %v1010_v39 = vmul.f32 1.442695, %v2336_v32 }
 0x1f8   : > { %v1012_v44 = vmul.f32 1.442695, %v2339_v47  ;;  %v1508_v42 = vpop.eup %1507  ;;  %v967_v43 = vpop.xlane.xlu0 %966  ;;  %v1024_v15 = vsel %vm921_vm0, %v1506_v36, 0.0 }
 0x1f9   : > { %v969_v41 = vpop.xlane.xlu1 %968  ;;  %1517 = vpow2.f32 %v1010_v39  ;;  %v2348_v46 = vsub.f32 %v2267_v45, %v967_v43  ;;  %1044 = vadd.xlane.f32.xlu1 %v1023_v10  ;;  %1046 = vadd.xlane.f32.xlu0 %v1024_v15  ;;  %v1025_v49 = vsel %vm921_vm0, %v1508_v42, 0.0 }
 0x1fa   : > { %v2351_v33 = vsub.f32 %v2269_v38, %v969_v41  ;;  %1519 = vpow2.f32 %v1012_v44 }
 0x1fb   : > { %v1510_v50 = vpop.eup %1509  ;;  %v1014_v57 = vmul.f32 1.442695, %v2348_v46 }
 0x1fc   : > { %v1016_v17 = vmul.f32 1.442695, %v2351_v33  ;;  %v1512_v22 = vpop.eup %1511  ;;  %v1026_v12 = vsel %vm921_vm0, %v1510_v50, 0.0 }
 0x1fd   : > { %1521 = vpow2.f32 %v1014_v57  ;;  %1048 = vadd.xlane.f32.xlu1 %v1025_v49  ;;  %1050 = vadd.xlane.f32.xlu0 %v1026_v12  ;;  %v1027_v45 = vsel %vm921_vm0, %v1512_v22, 0.0 }
 0x1fe   : > { %1523 = vpow2.f32 %v1016_v17 }
 0x1ff   : > { %v1514_v38 = vpop.eup %1513 }
 0x200   : > { %v1516_v59 = vpop.eup %1515  ;;  %v1028_v62 = vsel %vm921_vm0, %v1514_v38, 0.0 }
 0x201   : > { %1052 = vadd.xlane.f32.xlu1 %v1027_v45  ;;  %1054 = vadd.xlane.f32.xlu0 %v1028_v62  ;;  %v1029_v40 = vsel %vm921_vm0, %v1516_v59, 0.0 }
 0x203   : > { %v1518_v53 = vpop.eup %1517 }
 0x204   : > { %v1520_v16 = vpop.eup %1519  ;;  %v1030_v60 = vsel %vm921_vm0, %v1518_v53, 0.0 }
 0x205   : > { %1056 = vadd.xlane.f32.xlu1 %v1029_v40  ;;  %1058 = vadd.xlane.f32.xlu0 %v1030_v60  ;;  %v1031_v52 = vsel %vm921_vm0, %v1520_v16, 0.0 }
 0x207   : > { %v1522_v0 = vpop.eup %1521 }
 0x208   : > { %v1524_v63 = vpop.eup %1523  ;;  %v1032_v7 = vsel %vm921_vm0, %v1522_v0, 0.0 }
 0x209   : > { %1060 = vadd.xlane.f32.xlu1 %v1031_v52  ;;  %1062 = vadd.xlane.f32.xlu0 %v1032_v7  ;;  %v1033_v1 = vsel %vm921_vm0, %v1524_v63, 0.0 }
 0x20d   : > { %1064 = vadd.xlane.f32.xlu1 %v1033_v1 }
 0x27a   : > { %v1035_v5 = vpop.xlane.xlu0 %1034 }
 0x27b   : > { %1525 = vlog2.f32 %v1035_v5 }
 0x27e   : > { %v1037_v8 = vpop.xlane.xlu1 %1036  ;;  %v1039_v9 = vpop.xlane.xlu0 %1038 }
 0x27f   : > { %1527 = vlog2.f32 %v1037_v8 }
 0x280   : > { %1529 = vlog2.f32 %v1039_v9 }
 0x282   : > { %v1041_v6 = vpop.xlane.xlu1 %1040  ;;  %v1043_v2 = vpop.xlane.xlu0 %1042 }
 0x283   : > { %1531 = vlog2.f32 %v1041_v6 }
 0x284   : > { %1533 = vlog2.f32 %v1043_v2 }
 0x285   : > { %v1526_v29 = vpop.eup %1525 }
 0x286   : > { %v1067_v37 = vmul.f32 0.6931472, %v1526_v29  ;;  %v1045_v14 = vpop.xlane.xlu1 %1044  ;;  %v1047_v24 = vpop.xlane.xlu0 %1046 }
 0x287   : > { %1535 = vlog2.f32 %v1045_v14 }
 0x288   : > { %v1098_v20 = vsub.f32 %v2278_v51, %v1067_v37  ;;  %1537 = vlog2.f32 %v1047_v24 }
 0x289   : > { %v1528_v35 = vpop.eup %1527 }
 0x28a   : > { %v1530_v21 = vpop.eup %1529  ;;  %1114 = vst [vmem:[%s2451_s5] sm:$0xff] %v1098_v20  ;;  %v1069_v28 = vmul.f32 0.6931472, %v1528_v35  ;;  %v1049_v61 = vpop.xlane.xlu1 %1048 }
 0x28b   : > { %v1051_v26 = vpop.xlane.xlu0 %1050  ;;  %v1071_v27 = vmul.f32 0.6931472, %v1530_v21  ;;  %1539 = vlog2.f32 %v1049_v61 }
 0x28c   : > { %v1099_v54 = vsub.f32 %v2286_v30, %v1069_v28  ;;  %1541 = vlog2.f32 %v1051_v26 }
 0x28d   : > { %v1532_v31 = vpop.eup %1531  ;;  %v1100_v18 = vsub.f32 %v2281_v56, %v1071_v27 }
 0x28e   : > { %v1534_v55 = vpop.eup %1533  ;;  %1115 = vst [vmem:[%s2451_s5 + $0x8] sm:$0xff] %v1099_v54  ;;  %v1073_v51 = vmul.f32 0.6931472, %v1532_v31  ;;  %v1053_v23 = vpop.xlane.xlu1 %1052 }
 0x28f   : > { %v1055_v10 = vpop.xlane.xlu0 %1054  ;;  %1116 = vst [vmem:[%s2451_s5 + $0x10] sm:$0xff] %v1100_v18  ;;  %v1075_v36 = vmul.f32 0.6931472, %v1534_v55  ;;  %1543 = vlog2.f32 %v1053_v23 }
 0x290   : > { %v1101_v30 = vsub.f32 %v2289_v34, %v1073_v51  ;;  %1545 = vlog2.f32 %v1055_v10 }
 0x291   : > { %v1536_v39 = vpop.eup %1535  ;;  %v1102_v56 = vsub.f32 %v2294_v58, %v1075_v36 }
 0x292   : > { %v1538_v44 = vpop.eup %1537  ;;  %1117 = vst [vmem:[%s2451_s5 + $0x18] sm:$0xff] %v1101_v30  ;;  %v1077_v42 = vmul.f32 0.6931472, %v1536_v39  ;;  %v1057_v43 = vpop.xlane.xlu1 %1056 }
 0x293   : > { %v1059_v15 = vpop.xlane.xlu0 %1058  ;;  %1118 = vst [vmem:[%s2451_s5 + $0x20] sm:$0xff] %v1102_v56  ;;  %v1079_v41 = vmul.f32 0.6931472, %v1538_v44  ;;  %1547 = vlog2.f32 %v1057_v43 }
 0x294   : > { %v1103_v34 = vsub.f32 %v2297_v48, %v1077_v42  ;;  %1549 = vlog2.f32 %v1059_v15 }
 0x295   : > { %v1540_v49 = vpop.eup %1539  ;;  %v1104_v58 = vsub.f32 %v2302_v3, %v1079_v41 }
 0x296   : > { %v1542_v50 = vpop.eup %1541  ;;  %1119 = vst [vmem:[%s2451_s5 + $0x28] sm:$0xff] %v1103_v34  ;;  %v1081_v57 = vmul.f32 0.6931472, %v1540_v49  ;;  %v1061_v17 = vpop.xlane.xlu1 %1060 }
 0x297   : > { %v1063_v22 = vpop.xlane.xlu0 %1062  ;;  %1120 = vst [vmem:[%s2451_s5 + $0x30] sm:$0xff] %v1104_v58  ;;  %v1083_v12 = vmul.f32 0.6931472, %v1542_v50  ;;  %1551 = vlog2.f32 %v1061_v17 }
 0x298   : > { %v1105_v48 = vsub.f32 %v2305_v4, %v1081_v57  ;;  %1553 = vlog2.f32 %v1063_v22 }
 0x299   : > { %v1544_v45 = vpop.eup %1543  ;;  %v1106_v3 = vsub.f32 %v2312_v11, %v1083_v12 }
 0x29a   : > { %v1546_v38 = vpop.eup %1545  ;;  %1121 = vst [vmem:[%s2451_s5 + $0x38] sm:$0xff] %v1105_v48  ;;  %v1085_v59 = vmul.f32 0.6931472, %v1544_v45  ;;  %v1065_v62 = vpop.xlane.xlu1 %1064 }
 0x29b   : > { %1122 = vst [vmem:[%s2451_s5 + $0x40] sm:$0xff] %v1106_v3  ;;  %v1087_v40 = vmul.f32 0.6931472, %v1546_v38  ;;  %1555 = vlog2.f32 %v1065_v62 }
 0x29c   : > { %v1107_v53 = vsub.f32 %v2315_v13, %v1085_v59 }
 0x29d   : > { %v1548_v4 = vpop.eup %1547  ;;  %v1108_v16 = vsub.f32 %v2324_v25, %v1087_v40 }
 0x29e   : > { %v1550_v60 = vpop.eup %1549  ;;  %1123 = vst [vmem:[%s2451_s5 + $0x48] sm:$0xff] %v1107_v53  ;;  %v1089_v11 = vmul.f32 0.6931472, %v1548_v4 }
 0x29f   : > { %1124 = vst [vmem:[%s2451_s5 + $0x50] sm:$0xff] %v1108_v16  ;;  %v1091_v52 = vmul.f32 0.6931472, %v1550_v60 }
 0x2a0   : > { %v1109_v0 = vsub.f32 %v2327_v19, %v1089_v11 }
 0x2a1   : > { %v1552_v63 = vpop.eup %1551  ;;  %v1110_v7 = vsub.f32 %v2336_v32, %v1091_v52 }
 0x2a2   : > { %v1554_v13 = vpop.eup %1553  ;;  %1125 = vst [vmem:[%s2451_s5 + $0x58] sm:$0xff] %v1109_v0  ;;  %v1093_v25 = vmul.f32 0.6931472, %v1552_v63 }
 0x2a3   : > { %1126 = vst [vmem:[%s2451_s5 + $0x60] sm:$0xff] %v1110_v7  ;;  %v1095_v1 = vmul.f32 0.6931472, %v1554_v13 }
 0x2a4   : > { %v1111_v5 = vsub.f32 %v2339_v47, %v1093_v25 }
 0x2a5   : > { %v1556_v8 = vpop.eup %1555  ;;  %v1112_v9 = vsub.f32 %v2348_v46, %v1095_v1 }
 0x2a6   : > { %1127 = vst [vmem:[%s2451_s5 + $0x68] sm:$0xff] %v1111_v5  ;;  %v1097_v19 = vmul.f32 0.6931472, %v1556_v8 }
 0x2a7   : > { %1128 = vst [vmem:[%s2451_s5 + $0x70] sm:$0xff] %v1112_v9 }
 0x2a8   : > { %v1113_v32 = vsub.f32 %v2351_v33, %v1097_v19 }
 0x2aa   : > { %1129 = vst [vmem:[%s2451_s5 + $0x78] sm:$0xff] %v1113_v32 }
 0x2ab PF: > { %s15_s20 = sadd.s32 1, %s1579_s20   ;;  %s2452_s18 = smov %s1575_s19 }
 0x2ac   : > { %p12_p9 = scmp.ge.s32.totalorder %s15_s20, 7   ;;  %s2453_s19 = smov %s2455_s21 }
 0x2ae   :  { %14 = sbr.rel (!%p12_p9) target bundleno = 2 (0x2), region = 88 }

</bundles_post_ra>
